<compile_context>
chip_gen: v6e
topology: v6e:2x2x1
jax: 0.10.0
libtpu: 0.0.40
codegen_flags: <defaults>
</compile_context>

<pallas_src>
import functools
import math

import jax
import jax.numpy as jnp
from jax.experimental import pallas as pl
from jax.experimental.pallas import tpu as pltpu


# ---------------------------------------------------------------------------
# Config (small synthetic shapes consistent with the module)
# ---------------------------------------------------------------------------
BATCH = 2
SEQ = 8
HIDDEN = 32
INTERMEDIATE = 64
NUM_HEADS = 4
HEAD_DIM = HIDDEN // NUM_HEADS
NUM_LAYERS = 2
LN_EPS = 1e-6


def _gelu_tanh(x):
    # nn.functional.gelu(..., approximate='tanh'), computed in f32
    c = math.sqrt(2.0 / math.pi)
    return 0.5 * x * (1.0 + jnp.tanh(c * (x + 0.044715 * x * x * x)))


def _layer_norm(x, g, b, eps):
    mu = jnp.mean(x, axis=-1, keepdims=True)
    var = jnp.mean((x - mu) * (x - mu), axis=-1, keepdims=True)
    return (x - mu) * jax.lax.rsqrt(var + eps) * g + b


# ---------------------------------------------------------------------------
# Pallas kernel: the full SiglipEncoder, one grid step per layer
# ---------------------------------------------------------------------------
def siglip_encoder_kernel(
    x_ref,              # (B*S, D)   f32 input embeds, read once at layer 0
    ln1_g, ln1_b,       # (1, 1, D)  f32
    wqkv, bqkv,         # (1, D, 3D) bf16, (1, 1, 3D) f32  fused lane-dense QKV
    wo, bo,             # (1, D, D)  bf16, (1, 1, D)  f32
    ln2_g, ln2_b,       # (1, 1, D)  f32
    w1, b1,             # (1, D, I)  bf16, (1, 1, I)  f32
    w2, b2,             # (1, I, D)  bf16, (1, 1, D)  f32
    o_ref,              # (B*S, D)   f32 resident block: hidden state + output
    *, batch, seq, num_heads, head_dim, eps,
):
    layer = pl.program_id(0)
    d_model = num_heads * head_dim
    bf16 = jnp.bfloat16

    # Hidden state lives in the revisited output block (same block index every
    # grid step -> stays resident in VMEM, written back to HBM once at the end).
    @pl.when(layer == 0)
    def _():
        o_ref[...] = x_ref[...]

    x = o_ref[...]                                    # (B*S, D) f32

    # ---- LayerNorm 1 (f32) ----
    xn = _layer_norm(x, ln1_g[0], ln1_b[0], eps)

    # ---- Fused QKV projection: one lane-dense (B*S,D) @ (D,3D) matmul ----
    qkv = jnp.dot(xn.astype(bf16), wqkv[0],
                  preferred_element_type=jnp.float32) + bqkv[0]   # (B*S, 3D) f32

    scale = head_dim ** -0.5

    def split_heads(off):
        # (B*S, D) lane range -> (H*B, S, Dh): static lane slices stacked on a
        # new leading axis + flat-order reshape (no transposes).
        cols = [qkv[:, off + h * head_dim: off + (h + 1) * head_dim]
                for h in range(num_heads)]
        t = jnp.stack(cols, axis=0)                   # (H, B*S, Dh)
        return t.reshape(num_heads * batch, seq, head_dim)

    q = split_heads(0) * scale                        # (H*B, S, Dh) f32
    k = split_heads(d_model)
    v = split_heads(2 * d_model)

    # ---- Attention, batched over the leading (H*B) axis ----
    # TODO(synk): at production S=729 tile the (H*B, S, S) scores over query
    # blocks to bound the VMEM transient.
    s = jnp.einsum("gqd,gkd->gqk", q.astype(bf16), k.astype(bf16),
                   preferred_element_type=jnp.float32)            # (H*B, S, S)
    s = s - jnp.max(s, axis=-1, keepdims=True)
    p = jnp.exp(s)                                                # f32 softmax
    p = p * pl.reciprocal(jnp.sum(p, axis=-1, keepdims=True), approx=True)

    ho = jnp.einsum("gqk,gkd->gqd", p.astype(bf16), v.astype(bf16),
                    preferred_element_type=jnp.float32)           # (H*B, S, Dh)

    # Merge heads back to (B*S, D) (h-major feature order, matching PyTorch).
    ho = ho.reshape(num_heads, batch * seq, head_dim)             # flat-order
    merged = jnp.concatenate([ho[h] for h in range(num_heads)], axis=-1)

    # ---- Output projection: one (B*S, D) @ (D, D) matmul ----
    attn = jnp.dot(merged.astype(bf16), wo[0],
                   preferred_element_type=jnp.float32) + bo[0]

    h1 = x + attn                                     # residual 1 (f32)

    # ---- LayerNorm 2 + MLP (fc1 -> gelu(tanh) -> fc2) ----
    # TODO(synk): K-tile w1/w2 over the intermediate dim at production sizes.
    hn = _layer_norm(h1, ln2_g[0], ln2_b[0], eps)
    f = jnp.dot(hn.astype(bf16), w1[0],
                preferred_element_type=jnp.float32) + b1[0]
    f = _gelu_tanh(f)
    f = jnp.dot(f.astype(bf16), w2[0],
                preferred_element_type=jnp.float32) + b2[0]

    o_ref[...] = h1 + f                               # residual 2, carried on


# ---------------------------------------------------------------------------
# Wrapper
# ---------------------------------------------------------------------------
def _stacked_spec(arr):
    """BlockSpec for a (L, ...) stacked weight: one layer slab per grid step."""
    rest = arr.shape[1:]
    n = len(rest)
    return pl.BlockSpec((1,) + rest, lambda l, _n=n: (l,) + (0,) * _n)


def siglip_encoder(x, packed):
    """x: (B, S, D) float32; packed: dict of layer-stacked parameters."""
    B, S, D = x.shape
    L = packed["ln1_g"].shape[0]
    x_flat = x.reshape(B * S, D)

    order = ["ln1_g", "ln1_b", "wqkv", "bqkv", "wo", "bo",
             "ln2_g", "ln2_b", "w1", "b1", "w2", "b2"]
    weights = [packed[k] for k in order]

    kernel = functools.partial(
        siglip_encoder_kernel,
        batch=B, seq=S, num_heads=NUM_HEADS, head_dim=HEAD_DIM, eps=LN_EPS)

    in_specs = [pl.BlockSpec((B * S, D), lambda l: (0, 0))]   # fetched once
    in_specs += [_stacked_spec(w) for w in weights]

    out_flat = pl.pallas_call(
        kernel,
        out_shape=jax.ShapeDtypeStruct((B * S, D), jnp.float32),
        grid_spec=pltpu.PrefetchScalarGridSpec(
            num_scalar_prefetch=0,
            grid=(L,),
            in_specs=in_specs,
            # Same block every layer -> resident hidden-state carrier.
            out_specs=pl.BlockSpec((B * S, D), lambda l: (0, 0)),
        ),
        compiler_params=pltpu.CompilerParams(
            dimension_semantics=("arbitrary",),   # layer axis carries state
            vmem_limit_bytes=64 * 1024 * 1024,
        ),
        # TODO(synk): add a leading "parallel" batch grid axis for v7x megacore.
    )(x_flat, *weights)
    return out_flat.reshape(B, S, D)


# ---------------------------------------------------------------------------
# Parameter packing: PyTorch-style per-layer params -> kernel layout
#   * matmul weights cast to bf16 (MXU operands), lane-dense 2-D layouts
#   * biases / LN params stay f32 (added after f32 accumulation)
# ---------------------------------------------------------------------------
def pack_layer_params(layer_params):
    def stack(key, dtype=jnp.float32):
        return jnp.stack([p[key] for p in layer_params]).astype(dtype)

    packed = {
        "ln1_g": stack("ln1_g"), "ln1_b": stack("ln1_b"),
        "ln2_g": stack("ln2_g"), "ln2_b": stack("ln2_b"),
        "bo": stack("bo"), "b1": stack("b1"), "b2": stack("b2"),
        "wo": stack("wo", jnp.bfloat16),                     # (L, D, D)
        "w1": stack("w1", jnp.bfloat16),                     # (L, D, I)
        "w2": stack("w2", jnp.bfloat16),                     # (L, I, D)
    }
    packed["wqkv"] = jnp.stack([
        jnp.concatenate([p["wq"], p["wk"], p["wv"]], axis=1)
        for p in layer_params]).astype(jnp.bfloat16)         # (L, D, 3D)
    packed["bqkv"] = jnp.stack([
        jnp.concatenate([p["bq"], p["bk"], p["bv"]], axis=1)
        for p in layer_params])                              # (L, 1, 3D) f32
    return packed


# ---------------------------------------------------------------------------
# Pure-JAX reference (faithful to the PyTorch module, f32 end-to-end)
# ---------------------------------------------------------------------------
def _ref_layer(x, p):
    def ln(y, g, b):
        mu = jnp.mean(y, axis=-1, keepdims=True)
        var = jnp.mean((y - mu) ** 2, axis=-1, keepdims=True)
        return (y - mu) / jnp.sqrt(var + LN_EPS) * g + b

    xn = ln(x, p["ln1_g"], p["ln1_b"])
    q = xn @ p["wq"] + p["bq"]
    k = xn @ p["wk"] + p["bk"]
    v = xn @ p["wv"] + p["bv"]
    B, S, D = x.shape
    q = q.reshape(B, S, NUM_HEADS, HEAD_DIM).transpose(0, 2, 1, 3)
    k = k.reshape(B, S, NUM_HEADS, HEAD_DIM).transpose(0, 2, 1, 3)
    v = v.reshape(B, S, NUM_HEADS, HEAD_DIM).transpose(0, 2, 1, 3)
    s = jnp.einsum("bhqd,bhkd->bhqk", q, k) * HEAD_DIM ** (-0.5)
    p_attn = jax.nn.softmax(s, axis=-1)
    a = jnp.einsum("bhqk,bhkd->bhqd", p_attn, v)
    a = a.transpose(0, 2, 1, 3).reshape(B, S, D)
    a = a @ p["wo"] + p["bo"]
    h1 = x + a
    hn = ln(h1, p["ln2_g"], p["ln2_b"])
    f = hn @ p["w1"] + p["b1"]
    f = _gelu_tanh(f)
    f = f @ p["w2"] + p["b2"]
    return h1 + f


def _ref_encoder(x, layer_params):
    h = x
    for p in layer_params:
        h = _ref_layer(h, p)
    return h


# ---------------------------------------------------------------------------
# Deterministic parameter init (Linear weights stored as [in, out])
# ---------------------------------------------------------------------------
def init_layer_params(key, hidden, intermediate):
    ks = jax.random.split(key, 10)
    scale = 0.02
    return {
        "ln1_g": jnp.ones((1, hidden), jnp.float32),
        "ln1_b": jnp.zeros((1, hidden), jnp.float32),
        "wq": scale * jax.random.normal(ks[0], (hidden, hidden), jnp.float32),
        "bq": scale * jax.random.normal(ks[1], (1, hidden), jnp.float32),
        "wk": scale * jax.random.normal(ks[2], (hidden, hidden), jnp.float32),
        "bk": scale * jax.random.normal(ks[3], (1, hidden), jnp.float32),
        "wv": scale * jax.random.normal(ks[4], (hidden, hidden), jnp.float32),
        "bv": scale * jax.random.normal(ks[5], (1, hidden), jnp.float32),
        "wo": scale * jax.random.normal(ks[6], (hidden, hidden), jnp.float32),
        "bo": scale * jax.random.normal(ks[7], (1, hidden), jnp.float32),
        "ln2_g": jnp.ones((1, hidden), jnp.float32),
        "ln2_b": jnp.zeros((1, hidden), jnp.float32),
        "w1": scale * jax.random.normal(ks[8], (hidden, intermediate), jnp.float32),
        "b1": jnp.zeros((1, intermediate), jnp.float32),
        "w2": scale * jax.random.normal(ks[9], (intermediate, hidden), jnp.float32),
        "b2": jnp.zeros((1, hidden), jnp.float32),
    }


if __name__ == "__main__":
    key = jax.random.PRNGKey(0)
    k_in, *k_layers = jax.random.split(key, NUM_LAYERS + 1)

    input_embeds = jax.random.normal(k_in, (BATCH, SEQ, HIDDEN), jnp.float32)
    layer_params = [
        init_layer_params(k_layers[i], HIDDEN, INTERMEDIATE)
        for i in range(NUM_LAYERS)
    ]
    packed = pack_layer_params(layer_params)

    out = siglip_encoder(input_embeds, packed)
    out = jax.block_until_ready(out)

    ref = _ref_encoder(input_embeds, layer_params)
    assert out.shape == (BATCH, SEQ, HIDDEN)
    # Tolerance covers bf16 MXU operands (f32 accumulation) and the EUP
    # approximate-reciprocal in the softmax; reference is f32 end-to-end.
    assert jnp.allclose(out, ref, atol=3e-2, rtol=3e-2), (
        float(jnp.max(jnp.abs(out - ref)))
    )

    print("KERNEL_OK")
</pallas_src>

<mosaic_0001>
module attributes {stable_mosaic.version = 11 : i64} {
  func.func @siglip_encoder_kernel(%arg0: i32, %arg1: memref<16x32xf32, #tpu.memory_space<vmem>>, %arg2: memref<1x1x32xf32, #tpu.memory_space<vmem>>, %arg3: memref<1x1x32xf32, #tpu.memory_space<vmem>>, %arg4: memref<1x32x96xbf16, #tpu.memory_space<vmem>>, %arg5: memref<1x1x96xf32, #tpu.memory_space<vmem>>, %arg6: memref<1x32x32xbf16, #tpu.memory_space<vmem>>, %arg7: memref<1x1x32xf32, #tpu.memory_space<vmem>>, %arg8: memref<1x1x32xf32, #tpu.memory_space<vmem>>, %arg9: memref<1x1x32xf32, #tpu.memory_space<vmem>>, %arg10: memref<1x32x64xbf16, #tpu.memory_space<vmem>>, %arg11: memref<1x1x64xf32, #tpu.memory_space<vmem>>, %arg12: memref<1x64x32xbf16, #tpu.memory_space<vmem>>, %arg13: memref<1x1x32xf32, #tpu.memory_space<vmem>>, %arg14: memref<16x32xf32, #tpu.memory_space<vmem>>) attributes {dimension_semantics = [#tpu.dimension_semantics<arbitrary>], iteration_bounds = array<i64: 2>, scalar_prefetch = 0 : i64, scratch_operands = 0 : i64, tpu.core_type = #tpu.core_type<tc>, window_params = [{pipeline_mode = #tpu.pipeline_mode<synchronous>, transform_indices = @transform_0, window_bounds = array<i64: 16, 32>}, {transform_indices = @transform_1, window_bounds = array<i64: 1, 1, 32>}, {transform_indices = @transform_2, window_bounds = array<i64: 1, 1, 32>}, {transform_indices = @transform_3, window_bounds = array<i64: 1, 32, 96>}, {transform_indices = @transform_4, window_bounds = array<i64: 1, 1, 96>}, {transform_indices = @transform_5, window_bounds = array<i64: 1, 32, 32>}, {transform_indices = @transform_6, window_bounds = array<i64: 1, 1, 32>}, {transform_indices = @transform_7, window_bounds = array<i64: 1, 1, 32>}, {transform_indices = @transform_8, window_bounds = array<i64: 1, 1, 32>}, {transform_indices = @transform_9, window_bounds = array<i64: 1, 32, 64>}, {transform_indices = @transform_10, window_bounds = array<i64: 1, 1, 64>}, {transform_indices = @transform_11, window_bounds = array<i64: 1, 64, 32>}, {transform_indices = @transform_12, window_bounds = array<i64: 1, 1, 32>}, {pipeline_mode = #tpu.pipeline_mode<synchronous>, transform_indices = @transform_13, window_bounds = array<i64: 16, 32>}]} {
    %c0_i32 = arith.constant 0 : i32
    %0 = arith.cmpi eq, %arg0, %c0_i32 : i32
    %1 = arith.extui %0 : i1 to i32
    %c0_i32_0 = arith.constant 0 : i32
    %2 = arith.cmpi ne, %1, %c0_i32_0 : i32
    scf.if %2 {
      %c0_62 = arith.constant 0 : index
      %c0_63 = arith.constant 0 : index
      %166 = vector.load %arg1[%c0_62, %c0_63] : memref<16x32xf32, #tpu.memory_space<vmem>>, vector<16x32xf32>
      %c0_64 = arith.constant 0 : index
      %c0_65 = arith.constant 0 : index
      %167 = vector.load %arg14[%c0_64, %c0_65] : memref<16x32xf32, #tpu.memory_space<vmem>>, vector<16x32xf32>
      tpu.vector_store %arg14[%c0_64, %c0_65], %166 {strides = array<i32>} : memref<16x32xf32, #tpu.memory_space<vmem>>, vector<16x32xf32>,
    } else {
    }
    %c0 = arith.constant 0 : index
    %c0_1 = arith.constant 0 : index
    %3 = vector.load %arg14[%c0, %c0_1] : memref<16x32xf32, #tpu.memory_space<vmem>>, vector<16x32xf32>
    %c0_2 = arith.constant 0 : index
    %c0_3 = arith.constant 0 : index
    %c0_4 = arith.constant 0 : index
    %4 = vector.load %arg2[%c0_2, %c0_3, %c0_4] : memref<1x1x32xf32, #tpu.memory_space<vmem>>, vector<1x1x32xf32>
    %5 = vector.shape_cast %4 : vector<1x1x32xf32> to vector<1x32xf32>
    %c0_5 = arith.constant 0 : index
    %c0_6 = arith.constant 0 : index
    %c0_7 = arith.constant 0 : index
    %6 = vector.load %arg3[%c0_5, %c0_6, %c0_7] : memref<1x1x32xf32, #tpu.memory_space<vmem>>, vector<1x1x32xf32>
    %7 = vector.shape_cast %6 : vector<1x1x32xf32> to vector<1x32xf32>
    %cst = arith.constant dense<0.000000e+00> : vector<16xf32>
    %8 = vector.multi_reduction <add>, %3, %cst [1] : vector<16x32xf32> to vector<16xf32>
    %9 = vector.shape_cast %8 : vector<16xf32> to vector<16x1xf32>
    %cst_8 = arith.constant 3.200000e+01 : f32
    %10 = vector.broadcast %cst_8 : f32 to vector<16x1xf32>
    %11 = arith.divf %9, %10 : vector<16x1xf32>
    %12 = vector.broadcast %11 : vector<16x1xf32> to vector<16x32xf32>
    %13 = arith.subf %3, %12 : vector<16x32xf32>
    %14 = vector.broadcast %11 : vector<16x1xf32> to vector<16x32xf32>
    %15 = arith.subf %3, %14 : vector<16x32xf32>
    %16 = arith.mulf %13, %15 : vector<16x32xf32>
    %cst_9 = arith.constant dense<0.000000e+00> : vector<16xf32>
    %17 = vector.multi_reduction <add>, %16, %cst_9 [1] : vector<16x32xf32> to vector<16xf32>
    %18 = vector.shape_cast %17 : vector<16xf32> to vector<16x1xf32>
    %cst_10 = arith.constant 3.200000e+01 : f32
    %19 = vector.broadcast %cst_10 : f32 to vector<16x1xf32>
    %20 = arith.divf %18, %19 : vector<16x1xf32>
    %21 = vector.broadcast %11 : vector<16x1xf32> to vector<16x32xf32>
    %22 = arith.subf %3, %21 : vector<16x32xf32>
    %cst_11 = arith.constant 9.99999997E-7 : f32
    %23 = vector.broadcast %cst_11 : f32 to vector<16x1xf32>
    %24 = arith.addf %20, %23 : vector<16x1xf32>
    %25 = math.rsqrt %24 : vector<16x1xf32>
    %26 = vector.broadcast %25 : vector<16x1xf32> to vector<16x32xf32>
    %27 = arith.mulf %22, %26 : vector<16x32xf32>
    %28 = vector.broadcast %5 : vector<1x32xf32> to vector<16x32xf32>
    %29 = arith.mulf %27, %28 : vector<16x32xf32>
    %30 = vector.broadcast %7 : vector<1x32xf32> to vector<16x32xf32>
    %31 = arith.addf %29, %30 : vector<16x32xf32>
    %32 = arith.truncf %31 : vector<16x32xf32> to vector<16x32xbf16>
    %c0_12 = arith.constant 0 : index
    %c0_13 = arith.constant 0 : index
    %c0_14 = arith.constant 0 : index
    %33 = vector.load %arg4[%c0_12, %c0_13, %c0_14] : memref<1x32x96xbf16, #tpu.memory_space<vmem>>, vector<1x32x96xbf16>
    %34 = vector.shape_cast %33 : vector<1x32x96xbf16> to vector<32x96xbf16>
    %cst_15 = arith.constant dense<0.000000e+00> : vector<16x96xf32>
    %35 = tpu.matmul %32, %34, %cst_15 {dimension_numbers = #tpu.dot_dimension_numbers<[1], [0], [0], [1], [0, 0, 1, 1], [], []>} : vector<16x32xbf16>, vector<32x96xbf16>, vector<16x96xf32> -> vector<16x96xf32>
    %c0_16 = arith.constant 0 : index
    %c0_17 = arith.constant 0 : index
    %c0_18 = arith.constant 0 : index
    %36 = vector.load %arg5[%c0_16, %c0_17, %c0_18] : memref<1x1x96xf32, #tpu.memory_space<vmem>>, vector<1x1x96xf32>
    %37 = vector.shape_cast %36 : vector<1x1x96xf32> to vector<1x96xf32>
    %38 = vector.broadcast %37 : vector<1x96xf32> to vector<16x96xf32>
    %39 = arith.addf %35, %38 : vector<16x96xf32>
    %40 = vector.extract_strided_slice %39 {offsets = [0, 0], sizes = [16, 8], strides = [1, 1]} : vector<16x96xf32> to vector<16x8xf32>
    %41 = vector.extract_strided_slice %39 {offsets = [0, 8], sizes = [16, 8], strides = [1, 1]} : vector<16x96xf32> to vector<16x8xf32>
    %42 = vector.extract_strided_slice %39 {offsets = [0, 16], sizes = [16, 8], strides = [1, 1]} : vector<16x96xf32> to vector<16x8xf32>
    %43 = vector.extract_strided_slice %39 {offsets = [0, 24], sizes = [16, 8], strides = [1, 1]} : vector<16x96xf32> to vector<16x8xf32>
    %44 = vector.shape_cast %40 : vector<16x8xf32> to vector<1x16x8xf32>
    %45 = vector.shape_cast %41 : vector<16x8xf32> to vector<1x16x8xf32>
    %46 = vector.shape_cast %42 : vector<16x8xf32> to vector<1x16x8xf32>
    %47 = vector.shape_cast %43 : vector<16x8xf32> to vector<1x16x8xf32>
    %48 = tpu.concatenate %44, %45, %46, %47 in 0 : vector<1x16x8xf32>, vector<1x16x8xf32>, vector<1x16x8xf32>, vector<1x16x8xf32> -> vector<4x16x8xf32>
    %49 = vector.shape_cast %48 : vector<4x16x8xf32> to vector<8x8x8xf32>
    %cst_19 = arith.constant 0.353553385 : f32
    %50 = vector.broadcast %cst_19 : f32 to vector<8x8x8xf32>
    %51 = arith.mulf %49, %50 : vector<8x8x8xf32>
    %52 = vector.extract_strided_slice %39 {offsets = [0, 32], sizes = [16, 8], strides = [1, 1]} : vector<16x96xf32> to vector<16x8xf32>
    %53 = vector.extract_strided_slice %39 {offsets = [0, 40], sizes = [16, 8], strides = [1, 1]} : vector<16x96xf32> to vector<16x8xf32>
    %54 = vector.extract_strided_slice %39 {offsets = [0, 48], sizes = [16, 8], strides = [1, 1]} : vector<16x96xf32> to vector<16x8xf32>
    %55 = vector.extract_strided_slice %39 {offsets = [0, 56], sizes = [16, 8], strides = [1, 1]} : vector<16x96xf32> to vector<16x8xf32>
    %56 = vector.shape_cast %52 : vector<16x8xf32> to vector<1x16x8xf32>
    %57 = vector.shape_cast %53 : vector<16x8xf32> to vector<1x16x8xf32>
    %58 = vector.shape_cast %54 : vector<16x8xf32> to vector<1x16x8xf32>
    %59 = vector.shape_cast %55 : vector<16x8xf32> to vector<1x16x8xf32>
    %60 = tpu.concatenate %56, %57, %58, %59 in 0 : vector<1x16x8xf32>, vector<1x16x8xf32>, vector<1x16x8xf32>, vector<1x16x8xf32> -> vector<4x16x8xf32>
    %61 = vector.shape_cast %60 : vector<4x16x8xf32> to vector<8x8x8xf32>
    %62 = vector.extract_strided_slice %39 {offsets = [0, 64], sizes = [16, 8], strides = [1, 1]} : vector<16x96xf32> to vector<16x8xf32>
    %63 = vector.extract_strided_slice %39 {offsets = [0, 72], sizes = [16, 8], strides = [1, 1]} : vector<16x96xf32> to vector<16x8xf32>
    %64 = vector.extract_strided_slice %39 {offsets = [0, 80], sizes = [16, 8], strides = [1, 1]} : vector<16x96xf32> to vector<16x8xf32>
    %65 = vector.extract_strided_slice %39 {offsets = [0, 88], sizes = [16, 8], strides = [1, 1]} : vector<16x96xf32> to vector<16x8xf32>
    %66 = vector.shape_cast %62 : vector<16x8xf32> to vector<1x16x8xf32>
    %67 = vector.shape_cast %63 : vector<16x8xf32> to vector<1x16x8xf32>
    %68 = vector.shape_cast %64 : vector<16x8xf32> to vector<1x16x8xf32>
    %69 = vector.shape_cast %65 : vector<16x8xf32> to vector<1x16x8xf32>
    %70 = tpu.concatenate %66, %67, %68, %69 in 0 : vector<1x16x8xf32>, vector<1x16x8xf32>, vector<1x16x8xf32>, vector<1x16x8xf32> -> vector<4x16x8xf32>
    %71 = vector.shape_cast %70 : vector<4x16x8xf32> to vector<8x8x8xf32>
    %72 = arith.truncf %51 : vector<8x8x8xf32> to vector<8x8x8xbf16>
    %73 = arith.truncf %61 : vector<8x8x8xf32> to vector<8x8x8xbf16>
    "tpu.trace_start"() <{level = 10 : i32, message = "gqd,gkd->gqk"}> : () -> ()
    %cst_20 = arith.constant dense<0.000000e+00> : vector<8x8x8xf32>
    %74 = tpu.matmul %72, %73, %cst_20 {dimension_numbers = #tpu.dot_dimension_numbers<[2], [2], [1], [1], [0, 0, 0, 1, 1, 1], [0], [0]>} : vector<8x8x8xbf16>, vector<8x8x8xbf16>, vector<8x8x8xf32> -> vector<8x8x8xf32>
    "tpu.trace_stop"() : () -> ()
    %cst_21 = arith.constant dense<0xFF800000> : vector<8x8xf32>
    %75 = vector.multi_reduction <maximumf>, %74, %cst_21 [2] : vector<8x8x8xf32> to vector<8x8xf32>
    %76 = vector.shape_cast %75 : vector<8x8xf32> to vector<8x8x1xf32>
    %77 = vector.broadcast %76 : vector<8x8x1xf32> to vector<8x8x8xf32>
    %78 = arith.subf %74, %77 : vector<8x8x8xf32>
    %79 = math.exp %78 : vector<8x8x8xf32>
    %cst_22 = arith.constant dense<0.000000e+00> : vector<8x8xf32>
    %80 = vector.multi_reduction <add>, %79, %cst_22 [2] : vector<8x8x8xf32> to vector<8x8xf32>
    %81 = vector.shape_cast %80 : vector<8x8xf32> to vector<8x8x1xf32>
    %82 = tpu.reciprocal %81 {approx = true} : vector<8x8x1xf32> -> vector<8x8x1xf32>
    %83 = vector.broadcast %82 : vector<8x8x1xf32> to vector<8x8x8xf32>
    %84 = arith.mulf %79, %83 : vector<8x8x8xf32>
    %85 = arith.truncf %84 : vector<8x8x8xf32> to vector<8x8x8xbf16>
    %86 = arith.truncf %71 : vector<8x8x8xf32> to vector<8x8x8xbf16>
    "tpu.trace_start"() <{level = 10 : i32, message = "gqk,gkd->gqd"}> : () -> ()
    %cst_23 = arith.constant dense<0.000000e+00> : vector<8x8x8xf32>
    %87 = tpu.matmul %85, %86, %cst_23 {dimension_numbers = #tpu.dot_dimension_numbers<[2], [1], [1], [2], [0, 0, 0, 1, 1, 2], [0], [0]>} : vector<8x8x8xbf16>, vector<8x8x8xbf16>, vector<8x8x8xf32> -> vector<8x8x8xf32>
    "tpu.trace_stop"() : () -> ()
    %88 = vector.shape_cast %87 : vector<8x8x8xf32> to vector<4x16x8xf32>
    %89 = vector.extract_strided_slice %88 {offsets = [0, 0, 0], sizes = [1, 16, 8], strides = [1, 1, 1]} : vector<4x16x8xf32> to vector<1x16x8xf32>
    %90 = vector.shape_cast %89 : vector<1x16x8xf32> to vector<16x8xf32>
    %91 = vector.extract_strided_slice %88 {offsets = [1, 0, 0], sizes = [1, 16, 8], strides = [1, 1, 1]} : vector<4x16x8xf32> to vector<1x16x8xf32>
    %92 = vector.shape_cast %91 : vector<1x16x8xf32> to vector<16x8xf32>
    %93 = vector.extract_strided_slice %88 {offsets = [2, 0, 0], sizes = [1, 16, 8], strides = [1, 1, 1]} : vector<4x16x8xf32> to vector<1x16x8xf32>
    %94 = vector.shape_cast %93 : vector<1x16x8xf32> to vector<16x8xf32>
    %95 = vector.extract_strided_slice %88 {offsets = [3, 0, 0], sizes = [1, 16, 8], strides = [1, 1, 1]} : vector<4x16x8xf32> to vector<1x16x8xf32>
    %96 = vector.shape_cast %95 : vector<1x16x8xf32> to vector<16x8xf32>
    %97 = tpu.concatenate %90, %92, %94, %96 in 1 : vector<16x8xf32>, vector<16x8xf32>, vector<16x8xf32>, vector<16x8xf32> -> vector<16x32xf32>
    %98 = arith.truncf %97 : vector<16x32xf32> to vector<16x32xbf16>
    %c0_24 = arith.constant 0 : index
    %c0_25 = arith.constant 0 : index
    %c0_26 = arith.constant 0 : index
    %99 = vector.load %arg6[%c0_24, %c0_25, %c0_26] : memref<1x32x32xbf16, #tpu.memory_space<vmem>>, vector<1x32x32xbf16>
    %100 = vector.shape_cast %99 : vector<1x32x32xbf16> to vector<32x32xbf16>
    %cst_27 = arith.constant dense<0.000000e+00> : vector<16x32xf32>
    %101 = tpu.matmul %98, %100, %cst_27 {dimension_numbers = #tpu.dot_dimension_numbers<[1], [0], [0], [1], [0, 0, 1, 1], [], []>} : vector<16x32xbf16>, vector<32x32xbf16>, vector<16x32xf32> -> vector<16x32xf32>
    %c0_28 = arith.constant 0 : index
    %c0_29 = arith.constant 0 : index
    %c0_30 = arith.constant 0 : index
    %102 = vector.load %arg7[%c0_28, %c0_29, %c0_30] : memref<1x1x32xf32, #tpu.memory_space<vmem>>, vector<1x1x32xf32>
    %103 = vector.shape_cast %102 : vector<1x1x32xf32> to vector<1x32xf32>
    %104 = vector.broadcast %103 : vector<1x32xf32> to vector<16x32xf32>
    %105 = arith.addf %101, %104 : vector<16x32xf32>
    %106 = arith.addf %3, %105 : vector<16x32xf32>
    %c0_31 = arith.constant 0 : index
    %c0_32 = arith.constant 0 : index
    %c0_33 = arith.constant 0 : index
    %107 = vector.load %arg8[%c0_31, %c0_32, %c0_33] : memref<1x1x32xf32, #tpu.memory_space<vmem>>, vector<1x1x32xf32>
    %108 = vector.shape_cast %107 : vector<1x1x32xf32> to vector<1x32xf32>
    %c0_34 = arith.constant 0 : index
    %c0_35 = arith.constant 0 : index
    %c0_36 = arith.constant 0 : index
    %109 = vector.load %arg9[%c0_34, %c0_35, %c0_36] : memref<1x1x32xf32, #tpu.memory_space<vmem>>, vector<1x1x32xf32>
    %110 = vector.shape_cast %109 : vector<1x1x32xf32> to vector<1x32xf32>
    %cst_37 = arith.constant dense<0.000000e+00> : vector<16xf32>
    %111 = vector.multi_reduction <add>, %106, %cst_37 [1] : vector<16x32xf32> to vector<16xf32>
    %112 = vector.shape_cast %111 : vector<16xf32> to vector<16x1xf32>
    %cst_38 = arith.constant 3.200000e+01 : f32
    %113 = vector.broadcast %cst_38 : f32 to vector<16x1xf32>
    %114 = arith.divf %112, %113 : vector<16x1xf32>
    %115 = vector.broadcast %114 : vector<16x1xf32> to vector<16x32xf32>
    %116 = arith.subf %106, %115 : vector<16x32xf32>
    %117 = vector.broadcast %114 : vector<16x1xf32> to vector<16x32xf32>
    %118 = arith.subf %106, %117 : vector<16x32xf32>
    %119 = arith.mulf %116, %118 : vector<16x32xf32>
    %cst_39 = arith.constant dense<0.000000e+00> : vector<16xf32>
    %120 = vector.multi_reduction <add>, %119, %cst_39 [1] : vector<16x32xf32> to vector<16xf32>
    %121 = vector.shape_cast %120 : vector<16xf32> to vector<16x1xf32>
    %cst_40 = arith.constant 3.200000e+01 : f32
    %122 = vector.broadcast %cst_40 : f32 to vector<16x1xf32>
    %123 = arith.divf %121, %122 : vector<16x1xf32>
    %124 = vector.broadcast %114 : vector<16x1xf32> to vector<16x32xf32>
    %125 = arith.subf %106, %124 : vector<16x32xf32>
    %cst_41 = arith.constant 9.99999997E-7 : f32
    %126 = vector.broadcast %cst_41 : f32 to vector<16x1xf32>
    %127 = arith.addf %123, %126 : vector<16x1xf32>
    %128 = math.rsqrt %127 : vector<16x1xf32>
    %129 = vector.broadcast %128 : vector<16x1xf32> to vector<16x32xf32>
    %130 = arith.mulf %125, %129 : vector<16x32xf32>
    %131 = vector.broadcast %108 : vector<1x32xf32> to vector<16x32xf32>
    %132 = arith.mulf %130, %131 : vector<16x32xf32>
    %133 = vector.broadcast %110 : vector<1x32xf32> to vector<16x32xf32>
    %134 = arith.addf %132, %133 : vector<16x32xf32>
    %135 = arith.truncf %134 : vector<16x32xf32> to vector<16x32xbf16>
    %c0_42 = arith.constant 0 : index
    %c0_43 = arith.constant 0 : index
    %c0_44 = arith.constant 0 : index
    %136 = vector.load %arg10[%c0_42, %c0_43, %c0_44] : memref<1x32x64xbf16, #tpu.memory_space<vmem>>, vector<1x32x64xbf16>
    %137 = vector.shape_cast %136 : vector<1x32x64xbf16> to vector<32x64xbf16>
    %cst_45 = arith.constant dense<0.000000e+00> : vector<16x64xf32>
    %138 = tpu.matmul %135, %137, %cst_45 {dimension_numbers = #tpu.dot_dimension_numbers<[1], [0], [0], [1], [0, 0, 1, 1], [], []>} : vector<16x32xbf16>, vector<32x64xbf16>, vector<16x64xf32> -> vector<16x64xf32>
    %c0_46 = arith.constant 0 : index
    %c0_47 = arith.constant 0 : index
    %c0_48 = arith.constant 0 : index
    %139 = vector.load %arg11[%c0_46, %c0_47, %c0_48] : memref<1x1x64xf32, #tpu.memory_space<vmem>>, vector<1x1x64xf32>
    %140 = vector.shape_cast %139 : vector<1x1x64xf32> to vector<1x64xf32>
    %141 = vector.broadcast %140 : vector<1x64xf32> to vector<16x64xf32>
    %142 = arith.addf %138, %141 : vector<16x64xf32>
    %cst_49 = arith.constant 5.000000e-01 : f32
    %143 = vector.broadcast %cst_49 : f32 to vector<16x64xf32>
    %144 = arith.mulf %143, %142 : vector<16x64xf32>
    %cst_50 = arith.constant 4.471500e-02 : f32
    %145 = vector.broadcast %cst_50 : f32 to vector<16x64xf32>
    %146 = arith.mulf %145, %142 : vector<16x64xf32>
    %147 = arith.mulf %146, %142 : vector<16x64xf32>
    %148 = arith.mulf %147, %142 : vector<16x64xf32>
    %149 = arith.addf %142, %148 : vector<16x64xf32>
    %cst_51 = arith.constant 0.797884583 : f32
    %150 = vector.broadcast %cst_51 : f32 to vector<16x64xf32>
    %151 = arith.mulf %150, %149 : vector<16x64xf32>
    %152 = math.tanh %151 : vector<16x64xf32>
    %cst_52 = arith.constant 1.000000e+00 : f32
    %153 = vector.broadcast %cst_52 : f32 to vector<16x64xf32>
    %154 = arith.addf %153, %152 : vector<16x64xf32>
    %155 = arith.mulf %144, %154 : vector<16x64xf32>
    %156 = arith.truncf %155 : vector<16x64xf32> to vector<16x64xbf16>
    %c0_53 = arith.constant 0 : index
    %c0_54 = arith.constant 0 : index
    %c0_55 = arith.constant 0 : index
    %157 = vector.load %arg12[%c0_53, %c0_54, %c0_55] : memref<1x64x32xbf16, #tpu.memory_space<vmem>>, vector<1x64x32xbf16>
    %158 = vector.shape_cast %157 : vector<1x64x32xbf16> to vector<64x32xbf16>
    %cst_56 = arith.constant dense<0.000000e+00> : vector<16x32xf32>
    %159 = tpu.matmul %156, %158, %cst_56 {dimension_numbers = #tpu.dot_dimension_numbers<[1], [0], [0], [1], [0, 0, 1, 1], [], []>} : vector<16x64xbf16>, vector<64x32xbf16>, vector<16x32xf32> -> vector<16x32xf32>
    %c0_57 = arith.constant 0 : index
    %c0_58 = arith.constant 0 : index
    %c0_59 = arith.constant 0 : index
    %160 = vector.load %arg13[%c0_57, %c0_58, %c0_59] : memref<1x1x32xf32, #tpu.memory_space<vmem>>, vector<1x1x32xf32>
    %161 = vector.shape_cast %160 : vector<1x1x32xf32> to vector<1x32xf32>
    %162 = vector.broadcast %161 : vector<1x32xf32> to vector<16x32xf32>
    %163 = arith.addf %159, %162 : vector<16x32xf32>
    %164 = arith.addf %106, %163 : vector<16x32xf32>
    %c0_60 = arith.constant 0 : index
    %c0_61 = arith.constant 0 : index
    %165 = vector.load %arg14[%c0_60, %c0_61] : memref<16x32xf32, #tpu.memory_space<vmem>>, vector<16x32xf32>
    tpu.vector_store %arg14[%c0_60, %c0_61], %164 {strides = array<i32>} : memref<16x32xf32, #tpu.memory_space<vmem>>, vector<16x32xf32>,
    return
  }
  func.func @transform_0(%arg0: i32) -> (i32, i32) {
    %c0_i32 = arith.constant 0 : i32
    %c0_i32_0 = arith.constant 0 : i32
    %c0_i32_1 = arith.constant 0 : i32
    return %c0_i32, %c0_i32_0 : i32, i32
  }
  func.func @transform_1(%arg0: i32) -> (i32, i32, i32) {
    %c0_i32 = arith.constant 0 : i32
    %c0_i32_0 = arith.constant 0 : i32
    %c0_i32_1 = arith.constant 0 : i32
    return %arg0, %c0_i32, %c0_i32_0 : i32, i32, i32
  }
  func.func @transform_2(%arg0: i32) -> (i32, i32, i32) {
    %c0_i32 = arith.constant 0 : i32
    %c0_i32_0 = arith.constant 0 : i32
    %c0_i32_1 = arith.constant 0 : i32
    return %arg0, %c0_i32, %c0_i32_0 : i32, i32, i32
  }
  func.func @transform_3(%arg0: i32) -> (i32, i32, i32) {
    %c0_i32 = arith.constant 0 : i32
    %c0_i32_0 = arith.constant 0 : i32
    %c0_i32_1 = arith.constant 0 : i32
    return %arg0, %c0_i32, %c0_i32_0 : i32, i32, i32
  }
  func.func @transform_4(%arg0: i32) -> (i32, i32, i32) {
    %c0_i32 = arith.constant 0 : i32
    %c0_i32_0 = arith.constant 0 : i32
    %c0_i32_1 = arith.constant 0 : i32
    return %arg0, %c0_i32, %c0_i32_0 : i32, i32, i32
  }
  func.func @transform_5(%arg0: i32) -> (i32, i32, i32) {
    %c0_i32 = arith.constant 0 : i32
    %c0_i32_0 = arith.constant 0 : i32
    %c0_i32_1 = arith.constant 0 : i32
    return %arg0, %c0_i32, %c0_i32_0 : i32, i32, i32
  }
  func.func @transform_6(%arg0: i32) -> (i32, i32, i32) {
    %c0_i32 = arith.constant 0 : i32
    %c0_i32_0 = arith.constant 0 : i32
    %c0_i32_1 = arith.constant 0 : i32
    return %arg0, %c0_i32, %c0_i32_0 : i32, i32, i32
  }
  func.func @transform_7(%arg0: i32) -> (i32, i32, i32) {
    %c0_i32 = arith.constant 0 : i32
    %c0_i32_0 = arith.constant 0 : i32
    %c0_i32_1 = arith.constant 0 : i32
    return %arg0, %c0_i32, %c0_i32_0 : i32, i32, i32
  }
  func.func @transform_8(%arg0: i32) -> (i32, i32, i32) {
    %c0_i32 = arith.constant 0 : i32
    %c0_i32_0 = arith.constant 0 : i32
    %c0_i32_1 = arith.constant 0 : i32
    return %arg0, %c0_i32, %c0_i32_0 : i32, i32, i32
  }
  func.func @transform_9(%arg0: i32) -> (i32, i32, i32) {
    %c0_i32 = arith.constant 0 : i32
    %c0_i32_0 = arith.constant 0 : i32
    %c0_i32_1 = arith.constant 0 : i32
    return %arg0, %c0_i32, %c0_i32_0 : i32, i32, i32
  }
  func.func @transform_10(%arg0: i32) -> (i32, i32, i32) {
    %c0_i32 = arith.constant 0 : i32
    %c0_i32_0 = arith.constant 0 : i32
    %c0_i32_1 = arith.constant 0 : i32
    return %arg0, %c0_i32, %c0_i32_0 : i32, i32, i32
  }
  func.func @transform_11(%arg0: i32) -> (i32, i32, i32) {
    %c0_i32 = arith.constant 0 : i32
    %c0_i32_0 = arith.constant 0 : i32
    %c0_i32_1 = arith.constant 0 : i32
    return %arg0, %c0_i32, %c0_i32_0 : i32, i32, i32
  }
  func.func @transform_12(%arg0: i32) -> (i32, i32, i32) {
    %c0_i32 = arith.constant 0 : i32
    %c0_i32_0 = arith.constant 0 : i32
    %c0_i32_1 = arith.constant 0 : i32
    return %arg0, %c0_i32, %c0_i32_0 : i32, i32, i32
  }
  func.func @transform_13(%arg0: i32) -> (i32, i32) {
    %c0_i32 = arith.constant 0 : i32
    %c0_i32_0 = arith.constant 0 : i32
    %c0_i32_1 = arith.constant 0 : i32
    return %c0_i32, %c0_i32_0 : i32, i32
  }
}

</mosaic_0001>

<bundles_post_ra>
// kernel: tpu_custom_call.1
= control target key start
LH: loop header
LB: loop body
LE: loop exit
PB: predicated region body
PF: predicated region fallthrough
CT: control target
= control target key end

     0   :  { %s3242_s0 = inlined_call_operand.hbm [shape: f32[16,32], index: 0, kind: input, shape index: {}]   ;;  %s3243_s1 = inlined_call_operand.hbm [shape: f32[2,1,32], index: 1, kind: input, shape index: {}]   ;;  %s3244_s2 = inlined_call_operand.vmem [shape: f32[2,1,32], index: 2, kind: input, shape index: {}]   ;;  %s3245_s3 = inlined_call_operand.vmem [shape: bf16[2,32,96], index: 3, kind: input, shape index: {}]   ;;  %s3246_s4 = inlined_call_operand.vmem [shape: f32[2,1,96], index: 4, kind: input, shape index: {}]   ;;  %s3247_s5 = inlined_call_operand.vmem [shape: bf16[2,32,32], index: 5, kind: input, shape index: {}]   ;;  %s3248_s6 = inlined_call_operand.vmem [shape: f32[2,1,32], index: 6, kind: input, shape index: {}]   ;;  %s3249_s7 = inlined_call_operand.vmem [shape: f32[2,1,32], index: 7, kind: input, shape index: {}]   ;;  %s3250_s8 = inlined_call_operand.vmem [shape: f32[2,1,32], index: 8, kind: input, shape index: {}]   ;;  %s3251_s9 = inlined_call_operand.vmem [shape: bf16[2,32,64], index: 9, kind: input, shape index: {}]   ;;  %s3252_s10 = inlined_call_operand.vmem [shape: f32[2,1,64], index: 10, kind: input, shape index: {}]   ;;  %s3253_s11 = inlined_call_operand.vmem [shape: bf16[2,64,32], index: 11, kind: input, shape index: {}]   ;;  %s3254_s12 = inlined_call_operand.vmem [shape: f32[2,1,32], index: 12, kind: input, shape index: {}]   ;;  %s3255_s13 = inlined_call_operand.hbm [shape: f32[16,32], index: 13, kind: output, shape index: {}]  }
   0x1   :  { %3263 = sst [smem:[#allocation15_spill]] %s3242_s0 }
   0x2   :  { %3264 = sst [smem:[#allocation16_spill]] %s3243_s1 }
   0x3   :  { %3265 = sst [smem:[#allocation17_spill]] %s3245_s3 }
   0x4   :  { %3266 = sst [smem:[#allocation18_spill]] %s3247_s5 }
   0x5   :  { %3267 = sst [smem:[#allocation19_spill]] %s3251_s9 }
   0x6   :  { %3268 = sst [smem:[#allocation20_spill]] %s3252_s10 }
   0x7   :  { %3269 = sst [smem:[#allocation21_spill]] %s3253_s11 }
   0x8   :  { %3270 = sst [smem:[#allocation22_spill]] %s3254_s12 }
   0x9   :  { %3271 = sst [smem:[#allocation23_spill]] %s3255_s13 }
   0xa   :  { %18 = vsyncpa [#allocation3], 0 }
   0xb   :  { %19 = vsyncpa [#allocation6], 0 }
   0xc   :  { %21 = vsyncpa [#allocation6 + $0x1], 0 }
   0xd   :  { %22 = vsyncpa [#allocation4], 0  ;;  %s2765_s25 = smov 0   ;;  %s2767_s26 = smov 0  }
   0xe   :  { %s2769_s27 = smov 0   ;;  %s2771_s28 = smov 0  }
   0xf LB: > { %3272 = sst [smem:[#allocation11_spill]] %s2669_s26  ;;  %s2784_s29 = sadd.s32 4294967295, %s2677_s28   ;;  %s2677_s28 = sphi %s2771_s28, %s3300_s28   ;;  %s2673_s27 = sphi %s2769_s27, %s3303_s27   ;;  %s2669_s26 = sphi %s2767_s26, %s3302_s26   ;;  %s2665_s25 = sphi %s2765_s25, %s3301_s25  }
  0x10   : > { %3273 = sst [smem:[#allocation12_spill]] %s2673_s27  ;;  %p69_p0 = scmp.ne.s32.totalorder %s2669_s26, %s2665_s25 }
  0x11   : > { %p3258_p1 = scmp.eq.s32.totalorder %s2784_s29, 0  ;;  %p2179_p2 = scmp.ge.s32.totalorder %s2677_s28, 1 }
  0x12   : > { %p387_p3 = scmp.lt.s32.totalorder %s2677_s28, 3  ;;  %s2679_s15 = smov [#allocation2]  }
  0x13   : > { %p2793_p5 = por %p3258_p1, %p69_p0  ;;  %s399_s16 = sshll.u32 %s2679_s15, 4  ;;  %s400_s16 = int_to_ptr.vmem [resolvable:$true] %s399_s16 }
  0x14   : > { %p2797_p6 = pnand %p2179_p2, %p387_p3  ;;  %s2810_s18 = sadd.s32 1, %s2677_s28  }
  0x15   : > { %s3274_s30 = scalar_select %p2793_p5, 1, 0 }
  0x16   : > { %s3275_s14 = scalar_select %p2797_p6, 1, 0 }
  0x17   : > { %p2428_p7 = pneg %p2797_p6  ;;  %3277 = sst [smem:[#allocation13_spill]] %s2810_s18 }
  0x18   : > { %s56_s19 = sadd.s32 1, %s2673_s27  ;;  %s53_s20 = ssub.s32 %s2677_s28, %s2810_s18 }
  0x19   : > { %p2805_p8 = pnand %p2428_p7, %p3258_p1  ;;  %s2568_s21 = scalar_lea.vmem %s400_s16, 256 }
  0x1a   : > { %p2569_p10 = scmp.ne.s32.totalorder %s400_s16, %s2568_s21  ;;  %p2576_p13 = scmp.lt.s32.totalorder %s400_s16, %s400_s16 }
  0x1b   : > { %p2559_p9 = pneg %p2805_p8  ;;  %p2577_p0 = scmp.lt.s32.totalorder %s2568_s21, %s2568_s21 }
  0x1d   : > { %p2571_p11 = pnand %p2569_p10, %p2559_p9  ;;  %p2578_p2 = por %p2577_p0, %p2576_p13 }
  0x1f   : > { %p2572_p12 = pneg %p2571_p11 }
  0x21   : > { %p2579_p3 = pnand %p2578_p2, %p2572_p12 }
  0x23   : > { %2582 = shalt.err (!%p2579_p3)
}
  0x24   : > { %s2680_s22 = smov 128   ;;  %s2681_s23 = smov 8  }
  0x25   : > { %s3278_s0 = sld [smem:[#allocation15_spill]]  ;;  %p54_p7 = scmp.eq.s32.totalorder %s53_s20, 0 }
  0x26   : > { %p63_p9 = scmp.ne.s32.totalorder %s2673_s27, %s2669_s26  ;;  %p64_p10 = scmp.eq.s32.totalorder %s2677_s28, 0 }
  0x27   : > { %p2437_p11 = scmp.lt.s32.totalorder %s2677_s28, 2  ;;  %s413_s21 = sand.u32 1, %s2673_s27  }
  0x28   : > { %s2827_s15 = scalar_select %p54_p7, %s2673_s27, %s56_s19  }
  0x29   : > { %p65_p12 = por %p64_p10, %p63_p9  ;;  %s2182_s18 = sshll.u32 %s2677_s28, 4 }
  0x2a   : > { %3279 = sst [smem:[#allocation14_spill]] %s2827_s15  ;;  %s416_s13 = scalar_lea.vmem [#allocation5], %s413_s21 }
  0x2b   : > { %2431 = dma.hbm_to_vmem [thread:$0]  (!%p2805_p8), %s3278_s0, 256, %s400_s16, [#allocation3], %s2680_s22, %s2680_s22, %s2681_s23  }
  0x2c   : > { %s423_s11 = sshll.u32 %s416_s13, 4  ;;  %s3280_s1 = sld [smem:[#allocation16_spill]]  ;;  %s424_s11 = int_to_ptr.vmem [resolvable:$true] %s423_s11 }
  0x2d   : > { %p2836_p8 = pnand %p2437_p11, %p65_p12  ;;  %s414_s17 = scalar_lea.sflag [#allocation6], %s413_s21 }
  0x2f   : > { %p2585_p0 = pneg %p2836_p8 }
  0x32   : > { %s2834_s9 = scalar_lea.hbm %s3280_s1, %s2182_s18  ;;  %s2588_s12 = scalar_lea.hbm %s3280_s1, 32 }
  0x33   : > { %s2583_s19 = scalar_lea.hbm %s2834_s9, 16  ;;  %p2589_p7 = scmp.lt.s32.totalorder %s2834_s9, %s3280_s1 }
  0x34   : > { %p2584_p13 = scmp.ne.s32.totalorder %s2834_s9, %s2583_s19  ;;  %p2590_p9 = scmp.lt.s32.totalorder %s2588_s12, %s2583_s19 }
  0x36   : > { %p2586_p2 = pnand %p2585_p0, %p2584_p13  ;;  %p2591_p10 = por %p2590_p9, %p2589_p7 }
  0x38   : > { %p2587_p3 = pneg %p2586_p2 }
  0x3a   : > { %p2592_p11 = pnand %p2591_p10, %p2587_p3 }
  0x3c   : > { %2595 = shalt.err (!%p2592_p11)
}
  0x3d   : > { %s2596_s20 = scalar_lea.vmem %s424_s11, 16  ;;  %s2682_s22 = smov [#allocation5]  }
  0x3e   : > { %p2597_p12 = scmp.ne.s32.totalorder %s424_s11, %s2596_s20  ;;  %s2601_s23 = sshll.u32 %s2682_s22, 4  ;;  %s2602_s23 = int_to_ptr.vmem [resolvable:$false] %s2601_s23 }
  0x3f   : > { %s2603_s24 = scalar_lea.vmem %s2602_s23, 32  ;;  %p2604_p13 = scmp.lt.s32.totalorder %s424_s11, %s2602_s23 }
  0x40   : > { %p2599_p4 = pnand %p2597_p12, %p2585_p0  ;;  %p2605_p2 = scmp.lt.s32.totalorder %s2603_s24, %s2596_s20 }
  0x42   : > { %p2600_p1 = pneg %p2599_p4  ;;  %p2606_p5 = por %p2605_p2, %p2604_p13 }
  0x44   : > { %p2607_p6 = pnand %p2606_p5, %p2600_p1 }
  0x46   : > { %2610 = shalt.err (!%p2607_p6)
}
  0x47   : > { %2435 = dma.hbm_to_vmem [thread:$0]  (!%p2836_p8), %s2834_s9, 16, %s424_s11, %s414_s17  }
  0x48   : > { %p3282_p3 = scmp.ne.s32.totalorder %s3275_s14, 0 }
  0x49   : > { %p3283_p7 = scmp.eq.s32.totalorder (!%p3282_p3), %s2784_s29, 0 }
  0x4a   : > { %506 = sbr.rel (%p3282_p3) target bundleno = 2698 (0xa8a), region = 72 }
  0x4f   : > { %2652 = dma.done.wait (%p3283_p7), [#allocation3], 256   ;;  %p3284_p4 = pmov %p3283_p7 }
  0x50   : > { %s512_s25 = sand.u32 1, %s2669_s26   ;;  %p3285_p1 = scmp.ne.s32.totalorder %s3274_s30, 0 }
  0x51   : > { %2654 = vsyncadd (%p3284_p4), [#allocation3], 4294967040  ;;  %s513_s21 = scalar_lea.sflag [#allocation6], %s512_s25  ;;  %s2861_s19 = scalar_lea.vmem [#allocation5], %s512_s25 }
  0x52   : > { %2656 = dma.done.wait (%p3285_p1), %s513_s21, 16  }
  0x53   : > { %2658 = vsyncadd (%p3285_p1), %s513_s21, 4294967280  ;;  %p593_p5 = scmp.lt.s32.totalorder %s2784_s29, 1  ;;  %s3286_s3 = sld [smem:[#allocation17_spill]] }
  0x54   : > { %s3287_s5 = sld [smem:[#allocation18_spill]]  ;;  %p3292_p6 = scmp.ne.s32.totalorder %s2784_s29, 0 }
  0x55   : > { %s2869_s9 = scalar_select %p593_p5, %s2784_s29, 1 }
  0x56   : > { %s3288_s28 = sld [smem:[#allocation19_spill]] }
  0x57   : > { %s2236_s30 = sshll.u32 %s2869_s9, 4  ;;  %s617_s0 = scalar_lea.vmem %s3250_s8, %s2869_s9 }
  0x58   : > { %s2239_s15 = sshll.u32 %s2869_s9, 5  ;;  %s3290_s21 = sld [smem:[#allocation22_spill]] }
  0x59   : > { %s2879_s10 = scalar_lea.vmem %s3286_s3, %s2236_s30  ;;  %s3289_s3 = sld [smem:[#allocation20_spill]] }
  0x5a   : > { %s2888_s23 = scalar_lea.vmem %s3287_s5, %s2236_s30  ;;  %s3291_s16 = sld [smem:[#allocation21_spill]] }
  0x5c   : > { %s2905_s18 = scalar_lea.vmem %s3288_s28, %s2236_s30  ;;  %638 = sbr.rel (%p3292_p6) target bundleno = 99 (0x63), region = 84 }
  0x5e   : > { %s633_s27 = scalar_lea.vmem %s3290_s21, %s2869_s9 }
  0x5f   : > { %s625_s5 = scalar_lea.vmem %s3289_s3, %s2869_s9 }
  0x60   : > { %s2919_s26 = scalar_lea.vmem %s3291_s16, %s2239_s15 }
  0x61   : > { %v639_v0 = vld [vmem:[#allocation2] sm:$0xff]  ;;  %vm641_vm0 = vcmask 261120   ;;  %v640_v1 = vld [vmem:[#allocation2 + $0x8] sm:$0xff] }
  0x62   : > { %642 = vst.msk [vmem:[#allocation7] sm:$0xff] %vm641_vm0, %v639_v0  ;;  %643 = vst.msk [vmem:[#allocation7 + $0x8] sm:$0xff] %vm641_vm0, %v640_v1 }
  0x63 PF: > { %vm648_vm1 = vcmask 261120   ;;  %v2503_v16 = vld [vmem:[%s2879_s10 + $0x8] sm:$0xff]   ;;  %v2683_v17 = vmov 0.0   ;;  %vm2684_vm2 = vmmov 0   ;;  %v2504_v18 = vld [vmem:[%s2879_s10] sm:$0xff]   ;;  %s3293_s15 = scalar_lea.vmem %s3244_s2, %s2869_s9  ;;  %s2685_s10 = smov 120  }
  0x64   : > { %2286 = vmatprep.subr.bf16.mxu0 %v2683_v17  ;;  %2290 = vmatprep.mubr.msk.bf16.mxu0 %vm2684_vm2, %v2683_v17  ;;  %v2194_v27 = vld [vmem:[%s2861_s19] ss:$0 sm:$0xff]  ;;  %s3294_s19 = scalar_lea.vmem %s3246_s4, %s2869_s9  ;;  %s2686_s21 = smov 104   ;;  %vm807_vm3 = vcmask 64512   ;;  %vm1298_vm4 = vcmask 1043456   ;;  %vm1704_vm5 = vcmask 130048  }
  0x65   : > { %2287 = vmatpush3.bf16.msra.mxu0 %v2503_v16  ;;  %2294 = vmatprep.subr.bf16.mxu1 %v2683_v17  ;;  %v2195_v31 = vld [vmem:[%s3293_s15] ss:$0 sm:$0xff]  ;;  %s2687_s17 = smov 96   ;;  %s2688_s13 = smov 112   ;;  %vm1707_vm6 = vcmask 195584   ;;  %vm1950_vm7 = vcmask 523264  }
  0x66   : > { %2288 = vmatprep.subr.bf16.mxu0 %v2683_v17  ;;  %2296 = vmatprep.mubr.msk.bf16.mxu1 %vm2684_vm2, %v2683_v17  ;;  %v2196_v36 = vld [vmem:[%s3294_s19] ss:$0 sm:$0xff]  ;;  %s2689_s12 = smov 64   ;;  %s2690_s28 = smov 8  }
  0x67   : > { %s2691_s20 = smov 16   ;;  %s2692_s22 = smov 24  }
  0x68   : > { %s3295_s25 = scalar_lea.vmem %s3248_s6, %s2869_s9  ;;  %s2693_s19 = smov [#allocation7]  }
  0x69   : > { %v2923_v2 = vld [vmem:[#allocation7] sm:$0xff]  ;;  %v2925_v3 = vld [vmem:[#allocation7 + $0x8] sm:$0xff]  ;;  %2289 = vmatpush3.bf16.msra.mxu0 %v2504_v18  ;;  %p2439_p8 = scmp.eq.s32.totalorder %s2784_s29, 1 }
  0x6a   : > { %v649_v4 = vsel %vm648_vm1, %v2923_v2, 0.0  ;;  %v652_v5 = vsel %vm648_vm1, %v2925_v3, 0.0  ;;  %2300 = vmatprep.subr.bf16.mxu0 %v2683_v17 }
  0x6b   : > { %650 = vadd.xlane.f32.xlu0 %v649_v4 }
  0x6f   : > { %653 = vadd.xlane.f32.xlu0 %v652_v5 }
  0xf4   : > { %v651_v6 = vpop.xlane.xlu0 %650 }
  0xf5   : > { %v656_v7 = vmul.f32 0.03125, %v651_v6 }
  0xf7   : > { %v658_v8 = vsub.f32 %v2923_v2, %v656_v7 }
  0xf8   : > { %v654_v9 = vpop.xlane.xlu0 %653 }
  0xf9   : > { %v657_v10 = vmul.f32 0.03125, %v654_v9  ;;  %v660_v11 = vmul.f32 %v658_v8, %v658_v8 }
  0xfb   : > { %v659_v12 = vsub.f32 %v2925_v3, %v657_v10  ;;  %v662_v13 = vsel %vm648_vm1, %v660_v11, 0.0 }
  0xfc   : > { %663 = vadd.xlane.f32.xlu1 %v662_v13 }
  0xfd   : > { %v661_v14 = vmul.f32 %v659_v12, %v659_v12 }
  0xff   : > { %v665_v15 = vsel %vm648_vm1, %v661_v14, 0.0 }
 0x100   : > { %666 = vadd.xlane.f32.xlu1 %v665_v15 }
 0x185   : > { %v664_v19 = vpop.xlane.xlu1 %663 }
 0x186   : > { %v668_v20 = vmul.f32 0.03125, %v664_v19 }
 0x188   : > { %v670_v21 = vadd.f32 1e-06, %v668_v20 }
 0x189   : > { %v667_v22 = vpop.xlane.xlu1 %666 }
 0x18a   : > { %2513 = vrsqrt.f32 %v670_v21  ;;  %v669_v23 = vmul.f32 0.03125, %v667_v22 }
 0x18c   : > { %v671_v24 = vadd.f32 1e-06, %v669_v23 }
 0x18e   : > { %2515 = vrsqrt.f32 %v671_v24 }
 0x197   : > { %v2514_v25 = vpop.eup %2513 }
 0x198   : > { %v674_v26 = vmul.f32 %v2514_v25, %v658_v8 }
 0x19a   : > { %v682_v30 = vmul.f32 %v2194_v27, %v674_v26 }
 0x19b   : > { %v2516_v28 = vpop.eup %2515 }
 0x19c   : > { %v675_v29 = vmul.f32 %v2516_v28, %v659_v12  ;;  %v690_v33 = vadd.f32 %v2195_v31, %v682_v30 }
 0x19e   : > { %v683_v32 = vmul.f32 %v2194_v27, %v675_v29 }
 0x1a0   : > { %v691_v34 = vadd.f32 %v2195_v31, %v683_v32 }
 0x1a2   : > { %v692_v35 = vpack.c.bf16 %v691_v34, %v690_v33 }
 0x1a4   : > { %2291 = vmatmul.mubr.msk.bf16.vlgmr.msra.gmra.mxu0 %vm648_vm1, %v692_v35 }
 0x1a5   : > { %2302 = vmatprep.mubr.msk.bf16.mxu0 %vm2684_vm2, %v2683_v17 }
 0x264   : > { %v753_v37 = vpop.f32.mrf.mxu0 }
 0x265   : > { %v754_v38 = vadd.f32 %v2196_v36, %v753_v37 }
 0x266   : > { %v2292_v39 = vpop.f32.mrf.mxu0 }
 0x267   : > { %762 = vrot.lane.b32.xlu0 %v754_v38, %s2685_s10  ;;  %v2959_v43 = vpack.c.bf16 %v754_v38, %v754_v38  ;;  %v780_v54 = vmul.f32 0.35355338, %v754_v38 }
 0x268   : > { %v756_v40 = vpop.f32.mrf.mxu0 }
 0x269   : > { %v757_v41 = vadd.f32 %v2196_v36, %v756_v40  ;;  %v788_v58 = vpack.c.bf16 %v780_v54, %v780_v54 }
 0x26a   : > { %v2293_v42 = vpop.f32.mrf.mxu0 }
 0x26b   : > { %774 = vrot.lane.b32.xlu0 %v754_v38, %s2686_s21  ;;  %764 = vrot.lane.b32.xlu1 %v757_v41, %s2685_s10  ;;  %v2963_v44 = vpack.c.bf16 %v757_v41, %v757_v41  ;;  %v781_v63 = vmul.f32 0.35355338, %v757_v41  ;;  %s2005_s10 = sshll.u32 %s2693_s19, 4  ;;  %s2006_s10 = int_to_ptr.vmem [resolvable:$true] %s2005_s10 }
 0x26c   : > { %p2618_p11 = scmp.lt.s32.totalorder %s2006_s10, %s2006_s10 }
 0x26d   : > { %v789_v0 = vpack.c.bf16 %v781_v63, %v781_v63 }
 0x26f   : > { %805 = vrot.lane.b32.xlu0 %v2959_v43, %s2687_s17  ;;  %768 = vrot.lane.b32.xlu1 %v754_v38, %s2688_s13 }
 0x273   : > { %770 = vrot.lane.b32.xlu1 %v757_v41, %s2688_s13 }
 0x277   : > { %776 = vrot.lane.b32.xlu1 %v757_v41, %s2686_s21 }
 0x27b   : > { %855 = vrot.lane.b32.xlu1 %v2963_v44, %s2687_s17 }
 0x2d9   : > { %v763_v45 = vpop.permute.xlu0 %762 }
 0x2da   : > { %v2967_v46 = vpack.c.bf16 %v763_v45, %v763_v45  ;;  %v782_v5 = vmul.f32 0.35355338, %v763_v45 }
 0x2dc   : > { %904 = vrot.lane.b32.xlu0 %v2967_v46, %s2687_s17  ;;  %v790_v8 = vpack.c.bf16 %v782_v5, %v782_v5 }
 0x2dd   : > { %v2971_v47 = vpop.permute.xlu0 %774  ;;  %v765_v48 = vpop.permute.xlu1 %764 }
 0x2de   : > { %v2973_v49 = vpack.c.bf16 %v765_v48, %v765_v48  ;;  %v2985_v56 = vpack.c.bf16 %v2971_v47, %v2971_v47  ;;  %v783_v9 = vmul.f32 0.35355338, %v765_v48  ;;  %v786_v22 = vmul.f32 0.35355338, %v2971_v47 }
 0x2e0   : > { %953 = vrot.lane.b32.xlu1 %v2973_v49, %s2687_s17  ;;  %v791_v12 = vpack.c.bf16 %v783_v9, %v783_v9  ;;  %v794_v25 = vpack.c.bf16 %v786_v22, %v786_v22 }
 0x2e1   : > { %v806_v50 = vpop.permute.xlu0 %805  ;;  %v769_v51 = vpop.permute.xlu1 %768 }
 0x2e2   : > { %v2977_v52 = vpack.c.bf16 %v769_v51, %v769_v51  ;;  %v812_v53 = vsel %vm807_vm3, %v806_v50, 0  ;;  %v784_v13 = vmul.f32 0.35355338, %v769_v51 }
 0x2e3   : > { %2295 = vmatpush3.bf16.xpose.msra.mxu1 %v812_v53 }
 0x2e4   : > { %1002 = vrot.lane.b32.xlu0 %v2977_v52, %s2687_s17  ;;  %2306 = vmatprep.subr.bf16.mxu1 %v2683_v17  ;;  %v792_v18 = vpack.c.bf16 %v784_v13, %v784_v13 }
 0x2e5   : > { %v771_v55 = vpop.permute.xlu1 %770 }
 0x2e6   : > { %v2987_v57 = vpack.c.bf16 %v771_v55, %v771_v55  ;;  %v785_v19 = vmul.f32 0.35355338, %v771_v55 }
 0x2e8   : > { %1100 = vrot.lane.b32.xlu0 %v2985_v56, %s2687_s17  ;;  %1051 = vrot.lane.b32.xlu1 %v2987_v57, %s2687_s17  ;;  %v793_v23 = vpack.c.bf16 %v785_v19, %v785_v19 }
 0x2e9   : > { %v777_v59 = vpop.permute.xlu1 %776 }
 0x2ea   : > { %v2993_v60 = vpack.c.bf16 %v777_v59, %v777_v59  ;;  %2297 = vmatmul.mubr.msk.bf16.vlgmr.msra.gmra.mxu1 %vm807_vm3, %v788_v58  ;;  %v787_v26 = vmul.f32 0.35355338, %v777_v59 }
 0x2eb   : > { %2308 = vmatprep.mubr.msk.bf16.mxu1 %vm2684_vm2, %v2683_v17 }
 0x2ec   : > { %1149 = vrot.lane.b32.xlu1 %v2993_v60, %s2687_s17  ;;  %v795_v27 = vpack.c.bf16 %v787_v26, %v787_v26 }
 0x2ed   : > { %v856_v61 = vpop.permute.xlu1 %855 }
 0x2ee   : > { %v861_v62 = vsel %vm807_vm3, %v856_v61, 0 }
 0x2ef   : > { %2301 = vmatpush3.bf16.xpose.msra.mxu0 %v861_v62 }
 0x2f0   : > { %2312 = vmatprep.subr.bf16.mxu0 %v2683_v17 }
 0x2f6   : > { %2303 = vmatmul.mubr.msk.bf16.vlgmr.msra.gmra.mxu0 %vm807_vm3, %v789_v0 }
 0x2f7   : > { %2314 = vmatprep.mubr.msk.bf16.mxu0 %vm2684_vm2, %v2683_v17 }
 0x34e   : > { %v905_v1 = vpop.permute.xlu0 %904 }
 0x34f   : > { %v910_v4 = vsel %vm807_vm3, %v905_v1, 0 }
 0x350   : > { %2307 = vmatpush3.bf16.xpose.msra.mxu1 %v910_v4 }
 0x351   : > { %2318 = vmatprep.subr.bf16.mxu1 %v2683_v17 }
 0x352   : > { %v954_v6 = vpop.permute.xlu1 %953 }
 0x353   : > { %v959_v7 = vsel %vm807_vm3, %v954_v6, 0 }
 0x354   : > { %2313 = vmatpush3.bf16.xpose.msra.mxu0 %v959_v7 }
 0x355   : > { %2324 = vmatprep.subr.bf16.mxu0 %v2683_v17 }
 0x356   : > { %v1003_v10 = vpop.permute.xlu0 %1002 }
 0x357   : > { %v1008_v11 = vsel %vm807_vm3, %v1003_v10, 0  ;;  %2309 = vmatmul.mubr.msk.bf16.vlgmr.msra.gmra.mxu1 %vm807_vm3, %v790_v8 }
 0x358   : > { %2319 = vmatpush3.bf16.xpose.msra.mxu1 %v1008_v11  ;;  %2320 = vmatprep.mubr.msk.bf16.mxu1 %vm2684_vm2, %v2683_v17 }
 0x359   : > { %2330 = vmatprep.subr.bf16.mxu1 %v2683_v17 }
 0x35a   : > { %v1052_v14 = vpop.permute.xlu1 %1051  ;;  %v1101_v16 = vpop.permute.xlu0 %1100 }
 0x35b   : > { %v1057_v15 = vsel %vm807_vm3, %v1052_v14, 0  ;;  %2315 = vmatmul.mubr.msk.bf16.vlgmr.msra.gmra.mxu0 %vm807_vm3, %v791_v12  ;;  %v1106_v20 = vsel %vm807_vm3, %v1101_v16, 0 }
 0x35c   : > { %2325 = vmatpush3.bf16.xpose.msra.mxu0 %v1057_v15  ;;  %2326 = vmatprep.mubr.msk.bf16.mxu0 %vm2684_vm2, %v2683_v17 }
 0x35d   : > { %2336 = vmatprep.subr.bf16.mxu0 %v2683_v17 }
 0x35e   : > { %v1150_v21 = vpop.permute.xlu1 %1149 }
 0x35f   : > { %2321 = vmatmul.mubr.msk.bf16.vlgmr.msra.gmra.mxu1 %vm807_vm3, %v792_v18  ;;  %v1155_v24 = vsel %vm807_vm3, %v1150_v21, 0 }
 0x360   : > { %2331 = vmatpush3.bf16.xpose.msra.mxu1 %v1106_v20  ;;  %2332 = vmatprep.mubr.msk.bf16.mxu1 %vm2684_vm2, %v2683_v17 }
 0x361   : > { %2342 = vmatprep.subr.bf16.mxu1 %v2683_v17 }
 0x363   : > { %2327 = vmatmul.mubr.msk.bf16.vlgmr.msra.gmra.mxu0 %vm807_vm3, %v793_v23 }
 0x364   : > { %2337 = vmatpush3.bf16.xpose.msra.mxu0 %v1155_v24  ;;  %2338 = vmatprep.mubr.msk.bf16.mxu0 %vm2684_vm2, %v2683_v17 }
 0x365   : > { %2348 = vmatprep.subr.bf16.mxu0 %v2683_v17 }
 0x367   : > { %2333 = vmatmul.mubr.msk.bf16.vlgmr.msra.gmra.mxu1 %vm807_vm3, %v794_v25 }
 0x368   : > { %2344 = vmatprep.mubr.msk.bf16.mxu1 %vm2684_vm2, %v2683_v17 }
 0x36b   : > { %2339 = vmatmul.mubr.msk.bf16.vlgmr.msra.gmra.mxu0 %vm807_vm3, %v795_v27 }
 0x36c   : > { %2350 = vmatprep.mubr.msk.bf16.mxu0 %vm2684_vm2, %v2683_v17 }
 0x3aa   : > { %v848_v28 = vpop.f32.mrf.mxu1 }
 0x3ab   : > { %v1197_v29 = vsel %vm807_vm3, %v848_v28, -inf }
 0x3ac   : > { %v2298_v30 = vpop.f32.mrf.mxu1  ;;  %1198 = vmax.xlane.f32.xlu0 %v1197_v29 }
 0x3ae   : > { %v851_v31 = vpop.f32.mrf.mxu1 }
 0x3b0   : > { %v2299_v32 = vpop.f32.mrf.mxu1 }
 0x3b6   : > { %v897_v33 = vpop.f32.mrf.mxu0 }
 0x3b7   : > { %v1200_v34 = vsel %vm807_vm3, %v897_v33, -inf }
 0x3b8   : > { %1201 = vmax.xlane.f32.xlu1 %v1200_v34  ;;  %v2304_v35 = vpop.f32.mrf.mxu0 }
 0x3ba   : > { %v900_v36 = vpop.f32.mrf.mxu0 }
 0x3bc   : > { %v2305_v37 = vpop.f32.mrf.mxu0 }
 0x417   : > { %v946_v38 = vpop.f32.mrf.mxu1 }
 0x418   : > { %v1203_v39 = vsel %vm807_vm3, %v946_v38, -inf }
 0x419   : > { %v2310_v40 = vpop.f32.mrf.mxu1  ;;  %1204 = vmax.xlane.f32.xlu0 %v1203_v39 }
 0x41b   : > { %v949_v41 = vpop.f32.mrf.mxu1  ;;  %v995_v42 = vpop.f32.mrf.mxu0 }
 0x41c   : > { %v1206_v45 = vsel %vm807_vm3, %v995_v42, -inf }
 0x41d   : > { %v2311_v47 = vpop.f32.mrf.mxu1  ;;  %1207 = vmax.xlane.f32.xlu0 %v1206_v45  ;;  %v2316_v48 = vpop.f32.mrf.mxu0 }
 0x41f   : > { %v998_v50 = vpop.f32.mrf.mxu0  ;;  %v3040_v51 = vpop.f32.mrf.mxu1 }
 0x420   : > { %v1209_v53 = vsel %vm807_vm3, %v3040_v51, -inf }
 0x421   : > { %v2322_v54 = vpop.f32.mrf.mxu1  ;;  %1210 = vmax.xlane.f32.xlu0 %v1209_v53  ;;  %v2317_v55 = vpop.f32.mrf.mxu0 }
 0x423   : > { %v1047_v58 = vpop.f32.mrf.mxu1  ;;  %v1093_v59 = vpop.f32.mrf.mxu0 }
 0x424   : > { %v1212_v61 = vsel %vm807_vm3, %v1093_v59, -inf }
 0x425   : > { %v2323_v62 = vpop.f32.mrf.mxu1  ;;  %1213 = vmax.xlane.f32.xlu1 %v1212_v61  ;;  %v2328_v63 = vpop.f32.mrf.mxu0 }
 0x427   : > { %v1096_v0 = vpop.f32.mrf.mxu0  ;;  %v3045_v1 = vpop.f32.mrf.mxu1 }
 0x428   : > { %v1215_v4 = vsel %vm807_vm3, %v3045_v1, -inf }
 0x429   : > { %v2334_v5 = vpop.f32.mrf.mxu1  ;;  %1216 = vmax.xlane.f32.xlu0 %v1215_v4  ;;  %v2329_v6 = vpop.f32.mrf.mxu0 }
 0x42b   : > { %v1145_v7 = vpop.f32.mrf.mxu1  ;;  %v3049_v8 = vpop.f32.mrf.mxu0 }
 0x42c   : > { %v1218_v19 = vsel %vm807_vm3, %v3049_v8, -inf }
 0x42d   : > { %v2335_v9 = vpop.f32.mrf.mxu1  ;;  %v2340_v10 = vpop.f32.mrf.mxu0 }
 0x42f   : > { %v1194_v11 = vpop.f32.mrf.mxu0 }
 0x431   : > { %v2341_v12 = vpop.f32.mrf.mxu0 }
 0x435   : > { %v1199_v13 = vpop.xlane.xlu0 %1198 }
 0x436   : > { %1342 = vrot.lane.b32.xlu1 %v2963_v44, %s2689_s12  ;;  %v1221_v14 = vsub.f32 %v848_v28, %v1199_v13 }
 0x438   : > { %v1229_v15 = vmul.f32 1.442695, %v1221_v14 }
 0x43a   : > { %1390 = vrot.lane.b32.xlu1 %v2967_v46, %s2689_s12  ;;  %2517 = vpow2.f32 %v1229_v15 }
 0x43f   : > { %1293 = vrot.lane.b32.xlu0 %v2959_v43, %s2689_s12 }
 0x441   : > { %v1202_v44 = vpop.xlane.xlu1 %1201 }
 0x442   : > { %v1222_v46 = vsub.f32 %v897_v33, %v1202_v44 }
 0x444   : > { %v1231_v43 = vmul.f32 1.442695, %v1222_v46 }
 0x446   : > { %2519 = vpow2.f32 %v1231_v43 }
 0x447   : > { %v3057_v16 = vpop.eup %2517 }
 0x448   : > { %v1245_v18 = vsel %vm807_vm3, %v3057_v16, 0.0 }
 0x453   : > { %v3065_v20 = vpop.eup %2519 }
 0x454   : > { %v1248_v21 = vsel %vm807_vm3, %v3065_v20, 0.0 }
 0x45e   : > { %1246 = vadd.xlane.f32.xlu0 %v1245_v18  ;;  %1219 = vmax.xlane.f32.xlu1 %v1218_v19 }
 0x46f   : > { %1438 = vrot.lane.b32.xlu1 %v2973_v49, %s2689_s12 }
 0x493   : > { %1249 = vadd.xlane.f32.xlu1 %v1248_v21 }
 0x4a2   : > { %v1205_v22 = vpop.xlane.xlu0 %1204 }
 0x4a3   : > { %v1223_v23 = vsub.f32 %v946_v38, %v1205_v22 }
 0x4a4   : > { %1534 = vrot.lane.b32.xlu1 %v2987_v57, %s2689_s12 }
 0x4a5   : > { %v1233_v24 = vmul.f32 1.442695, %v1223_v23 }
 0x4a6   : > { %v1208_v25 = vpop.xlane.xlu0 %1207 }
 0x4a7   : > { %2521 = vpow2.f32 %v1233_v24  ;;  %v1224_v27 = vsub.f32 %v995_v42, %v1208_v25 }
 0x4a9   : > { %v1235_v30 = vmul.f32 1.442695, %v1224_v27 }
 0x4aa   : > { %v1211_v26 = vpop.xlane.xlu0 %1210 }
 0x4ab   : > { %2523 = vpow2.f32 %v1235_v30  ;;  %v1225_v41 = vsub.f32 %v3040_v51, %v1211_v26 }
 0x4ad   : > { %v1237_v42 = vmul.f32 1.442695, %v1225_v41 }
 0x4ae   : > { %v1214_v49 = vpop.xlane.xlu1 %1213 }
 0x4af   : > { %v1226_v31 = vsub.f32 %v1093_v59, %v1214_v49 }
 0x4b1   : > { %v1239_v35 = vmul.f32 1.442695, %v1226_v31 }
 0x4b2   : > { %v1217_v28 = vpop.xlane.xlu0 %1216  ;;  %v1343_v29 = vpop.permute.xlu1 %1342 }
 0x4b3   : > { %v1348_v32 = vsel %vm1298_vm4, %v1343_v29, 0  ;;  %2525 = vpow2.f32 %v1239_v35  ;;  %v1227_v45 = vsub.f32 %v3045_v1, %v1217_v28 }
 0x4b4   : > { %v3072_v33 = vpop.eup %2521  ;;  %2349 = vmatpush3.bf16.msra.mxu0 %v1348_v32  ;;  %2527 = vpow2.f32 %v1237_v42 }
 0x4b5   : > { %v1251_v34 = vsel %vm807_vm3, %v3072_v33, 0.0  ;;  %2360 = vmatprep.subr.bf16.mxu0 %v2683_v17  ;;  %v1241_v47 = vmul.f32 1.442695, %v1227_v45 }
 0x4b6   : > { %1252 = vadd.xlane.f32.xlu0 %v1251_v34  ;;  %v1294_v57 = vpop.permute.xlu0 %1293  ;;  %v1391_v48 = vpop.permute.xlu1 %1390 }
 0x4b7   : > { %v1300_v36 = vsel %vm1298_vm4, %v1294_v57, 0  ;;  %2529 = vpow2.f32 %v1241_v47  ;;  %v1396_v1 = vsel %vm1298_vm4, %v1391_v48, 0 }
 0x4b8   : > { %2343 = vmatpush3.bf16.msra.mxu1 %v1300_v36  ;;  %v3079_v37 = vpop.eup %2523 }
 0x4b9   : > { %2354 = vmatprep.subr.bf16.mxu1 %v2683_v17  ;;  %v1254_v38 = vsel %vm807_vm3, %v3079_v37, 0.0 }
 0x4c0   : > { %v3083_v39 = vpop.eup %2525 }
 0x4c1   : > { %v1260_v40 = vsel %vm807_vm3, %v3083_v39, 0.0  ;;  %v3091_v50 = vpop.eup %2527 }
 0x4c4   : > { %v3096_v59 = vpop.eup %2529 }
 0x4c5   : > { %v1263_v51 = vsel %vm807_vm3, %v3096_v59, 0.0 }
 0x4c8   : > { %1255 = vadd.xlane.f32.xlu1 %v1254_v38 }
 0x4cc   : > { %1486 = vrot.lane.b32.xlu0 %v2977_v52, %s2689_s12  ;;  %1261 = vadd.xlane.f32.xlu1 %v1260_v40  ;;  %v1257_v52 = vsel %vm807_vm3, %v3091_v50, 0.0 }
 0x4e7   : > { %v1247_v53 = vpop.xlane.xlu0 %1246  ;;  %v1220_v54 = vpop.xlane.xlu1 %1219 }
 0x4e8   : > { %2531 = vrcp.f32 %v1247_v53  ;;  %v1228_v55 = vsub.f32 %v3049_v8, %v1220_v54 }
 0x4ea   : > { %v1243_v58 = vmul.f32 1.442695, %v1228_v55 }
 0x4eb   : > { %1258 = vadd.xlane.f32.xlu0 %v1257_v52  ;;  %v1439_v5 = vpop.permute.xlu1 %1438 }
 0x4ec   : > { %2533 = vpow2.f32 %v1243_v58  ;;  %v1444_v10 = vsel %vm1298_vm4, %v1439_v5, 0 }
 0x4ef   : > { %1264 = vadd.xlane.f32.xlu0 %v1263_v51 }
 0x4f5   : > { %v2532_v61 = vpop.eup %2531 }
 0x4f6   : > { %v1277_v62 = vmul.f32 %v2532_v61, %v3057_v16 }
 0x4f8   : > { %v1285_v63 = vpack.c.bf16 %v1277_v62, %v1277_v62 }
 0x4f9   : > { %v3101_v0 = vpop.eup %2533 }
 0x4fa   : > { %2345 = vmatmul.mubr.msk.bf16.vlgmr.msra.gmra.mxu1 %vm807_vm3, %v1285_v63  ;;  %v1266_v4 = vsel %vm807_vm3, %v3101_v0, 0.0 }
 0x4fb   : > { %2355 = vmatpush3.bf16.msra.mxu1 %v1396_v1  ;;  %1267 = vadd.xlane.f32.xlu1 %v1266_v4  ;;  %v2505_v1 = vld [vmem:[%s2888_s23 + $0x8] sm:$0xff]  }
 0x4fc   : > { %2356 = vmatprep.mubr.msk.bf16.mxu1 %vm2684_vm2, %v2683_v17  ;;  %2366 = vmatprep.subr.bf16.mxu1 %v2683_v17 }
 0x505   : > { %1582 = vrot.lane.b32.xlu0 %v2985_v56, %s2689_s12 }
 0x50c   : > { %1630 = vrot.lane.b32.xlu1 %v2993_v60, %s2689_s12 }
 0x51c   : > { %v1250_v6 = vpop.xlane.xlu1 %1249 }
 0x51d   : > { %2535 = vrcp.f32 %v1250_v6 }
 0x520   : > { %v1535_v11 = vpop.permute.xlu1 %1534 }
 0x52a   : > { %v2536_v7 = vpop.eup %2535 }
 0x52b   : > { %v1278_v8 = vmul.f32 %v2536_v7, %v3065_v20  ;;  %v1540_v20 = vsel %vm1298_vm4, %v1535_v11, 0 }
 0x52d   : > { %v1286_v9 = vpack.c.bf16 %v1278_v8, %v1278_v8 }
 0x52f   : > { %2351 = vmatmul.mubr.msk.bf16.vlgmr.msra.gmra.mxu0 %vm807_vm3, %v1286_v9  ;;  %v2506_v9 = vld [vmem:[%s2888_s23] sm:$0xff]  }
 0x530   : > { %2361 = vmatpush3.bf16.msra.mxu0 %v1444_v10  ;;  %2362 = vmatprep.mubr.msk.bf16.mxu0 %vm2684_vm2, %v2683_v17 }
 0x531   : > { %2372 = vmatprep.subr.bf16.mxu0 %v2683_v17 }
 0x53f   : > { %v1253_v56 = vpop.xlane.xlu0 %1252 }
 0x540   : > { %2537 = vrcp.f32 %v1253_v56 }
 0x543   : > { %v1487_v13 = vpop.permute.xlu0 %1486 }
 0x544   : > { %v1492_v16 = vsel %vm1298_vm4, %v1487_v13, 0 }
 0x54d   : > { %v2538_v60 = vpop.eup %2537 }
 0x54e   : > { %v1279_v12 = vmul.f32 %v2538_v60, %v3072_v33 }
 0x550   : > { %v1287_v14 = vpack.c.bf16 %v1279_v12, %v1279_v12 }
 0x551   : > { %v1256_v15 = vpop.xlane.xlu1 %1255 }
 0x552   : > { %2539 = vrcp.f32 %v1256_v15  ;;  %2357 = vmatmul.mubr.msk.bf16.vlgmr.msra.gmra.mxu1 %vm807_vm3, %v1287_v14 }
 0x553   : > { %2367 = vmatpush3.bf16.msra.mxu1 %v1492_v16  ;;  %2368 = vmatprep.mubr.msk.bf16.mxu1 %vm2684_vm2, %v2683_v17 }
 0x554   : > { %2378 = vmatprep.subr.bf16.mxu1 %v2683_v17 }
 0x555   : > { %v1262_v18 = vpop.xlane.xlu1 %1261 }
 0x556   : > { %2541 = vrcp.f32 %v1262_v18 }
 0x55f   : > { %v2540_v19 = vpop.eup %2539 }
 0x560   : > { %v1280_v44 = vmul.f32 %v2540_v19, %v3079_v37 }
 0x562   : > { %v1288_v46 = vpack.c.bf16 %v1280_v44, %v1280_v44 }
 0x563   : > { %v2542_v43 = vpop.eup %2541 }
 0x564   : > { %2363 = vmatmul.mubr.msk.bf16.vlgmr.msra.gmra.mxu0 %vm807_vm3, %v1288_v46  ;;  %v1282_v21 = vmul.f32 %v2542_v43, %v3083_v39 }
 0x565   : > { %2373 = vmatpush3.bf16.msra.mxu0 %v1540_v20  ;;  %2374 = vmatprep.mubr.msk.bf16.mxu0 %vm2684_vm2, %v2683_v17 }
 0x566   : > { %2384 = vmatprep.subr.bf16.mxu0 %v2683_v17  ;;  %v1290_v22 = vpack.c.bf16 %v1282_v21, %v1282_v21 }
 0x56c   : > { %2375 = vmatmul.mubr.msk.bf16.vlgmr.msra.gmra.mxu0 %vm807_vm3, %v1290_v22 }
 0x56d   : > { %2386 = vmatprep.mubr.msk.bf16.mxu0 %vm2684_vm2, %v2683_v17 }
 0x574   : > { %v1259_v23 = vpop.xlane.xlu0 %1258 }
 0x575   : > { %2543 = vrcp.f32 %v1259_v23 }
 0x578   : > { %v1265_v24 = vpop.xlane.xlu0 %1264 }
 0x579   : > { %2545 = vrcp.f32 %v1265_v24 }
 0x57c   : > { %v1583_v49 = vpop.permute.xlu0 %1582 }
 0x57d   : > { %v1588_v30 = vsel %vm1298_vm4, %v1583_v49, 0 }
 0x582   : > { %v2544_v25 = vpop.eup %2543 }
 0x583   : > { %v1281_v26 = vmul.f32 %v2544_v25, %v3091_v50 }
 0x584   : > { %v1268_v27 = vpop.xlane.xlu1 %1267 }
 0x585   : > { %2547 = vrcp.f32 %v1268_v27  ;;  %v1289_v28 = vpack.c.bf16 %v1281_v26, %v1281_v26 }
 0x586   : > { %v2546_v29 = vpop.eup %2545 }
 0x587   : > { %2369 = vmatmul.mubr.msk.bf16.vlgmr.msra.gmra.mxu1 %vm807_vm3, %v1289_v28  ;;  %v1283_v33 = vmul.f32 %v2546_v29, %v3096_v59 }
 0x588   : > { %2379 = vmatpush3.bf16.msra.mxu1 %v1588_v30  ;;  %v1631_v31 = vpop.permute.xlu1 %1630  ;;  %2380 = vmatprep.mubr.msk.bf16.mxu1 %vm2684_vm2, %v2683_v17  ;;  %v2216_v30 = vld [vmem:[%s3295_s25] ss:$0 sm:$0xff] }
 0x589   : > { %v1636_v32 = vsel %vm1298_vm4, %v1631_v31, 0  ;;  %2390 = vmatprep.subr.bf16.mxu1 %v2683_v17  ;;  %v1291_v34 = vpack.c.bf16 %v1283_v33, %v1283_v33 }
 0x58a   : > { %2385 = vmatpush3.bf16.msra.mxu0 %v1636_v32 }
 0x58b   : > { %2398 = vmatprep.subr.bf16.mxu0 %v2683_v17 }
 0x58f   : > { %2381 = vmatmul.mubr.msk.bf16.vlgmr.msra.gmra.mxu1 %vm807_vm3, %v1291_v34 }
 0x590   : > { %2394 = vmatprep.mubr.msk.bf16.mxu1 %vm2684_vm2, %v2683_v17  ;;  %2391 = vmatpush3.bf16.msra.mxu1 %v2505_v1 }
 0x591   : > { %2392 = vmatprep.subr.bf16.mxu1 %v2683_v17 }
 0x592   : > { %v2548_v57 = vpop.eup %2547 }
 0x593   : > { %v1284_v35 = vmul.f32 %v2548_v57, %v3101_v0 }
 0x594   : > { %2393 = vmatpush3.bf16.msra.mxu1 %v2506_v9 }
 0x595   : > { %v1292_v36 = vpack.c.bf16 %v1284_v35, %v1284_v35  ;;  %2406 = vmatprep.subr.bf16.mxu1 %v2683_v17 }
 0x597   : > { %2387 = vmatmul.mubr.msk.bf16.vlgmr.msra.gmra.mxu0 %vm807_vm3, %v1292_v36 }
 0x598   : > { %2402 = vmatprep.mubr.msk.bf16.mxu0 %vm2684_vm2, %v2683_v17 }
 0x5ba   : > { %v1336_v37 = vpop.f32.mrf.mxu1 }
 0x5bc   : > { %v2346_v38 = vpop.f32.mrf.mxu1 }
 0x5be   : > { %v1339_v39 = vpop.f32.mrf.mxu1 }
 0x5c0   : > { %v2347_v40 = vpop.f32.mrf.mxu1 }
 0x5ef   : > { %v1384_v41 = vpop.f32.mrf.mxu0 }
 0x5f1   : > { %v2352_v42 = vpop.f32.mrf.mxu0 }
 0x5f3   : > { %v1387_v45 = vpop.f32.mrf.mxu0 }
 0x5f5   : > { %v2353_v47 = vpop.f32.mrf.mxu0 }
 0x612   : > { %v1432_v48 = vpop.f32.mrf.mxu1 }
 0x614   : > { %v2358_v50 = vpop.f32.mrf.mxu1 }
 0x616   : > { %v1435_v53 = vpop.f32.mrf.mxu1 }
 0x618   : > { %v2359_v54 = vpop.f32.mrf.mxu1 }
 0x619   : > { %v2507_v54 = vld [vmem:[%s2905_s18 + $0x8] sm:$0xff]  }
 0x61a   : > { %2399 = vmatpush3.bf16.msra.mxu0 %v2507_v54 }
 0x61b   : > { %2400 = vmatprep.subr.bf16.mxu0 %v2683_v17 }
 0x624   : > { %v1480_v55 = vpop.f32.mrf.mxu0 }
 0x625   : > { %v2488_v58 = vpack.i.bf16 %v1480_v55, %v1432_v48  ;;  %v2508_v55 = vld [vmem:[%s2905_s18] sm:$0xff]   ;;  %s3296_s18 = scalar_lea.vmem %s3249_s7, %s2869_s9 }
 0x626   : > { %v2364_v52 = vpop.f32.mrf.mxu0  ;;  %2401 = vmatpush3.bf16.msra.mxu0 %v2508_v55  ;;  %v2220_v1 = vld [vmem:[%s3296_s18] ss:$0 sm:$0xff] }
 0x627   : > { %2489 = vrot.lane.b32.xlu0 %v2488_v58, %s2690_s28 }
 0x628   : > { %v1483_v59 = vpop.f32.mrf.mxu0 }
 0x62a   : > { %v2365_v51 = vpop.f32.mrf.mxu0 }
 0x62c   : > { %v1576_v61 = vpop.f32.mrf.mxu0 }
 0x62e   : > { %v2376_v62 = vpop.f32.mrf.mxu0 }
 0x630   : > { %v1579_v63 = vpop.f32.mrf.mxu0 }
 0x632   : > { %v2377_v0 = vpop.f32.mrf.mxu0 }
 0x647   : > { %v1528_v4 = vpop.f32.mrf.mxu1 }
 0x648   : > { %v2493_v5 = vpack.i.bf16 %v1576_v61, %v1528_v4 }
 0x649   : > { %v2370_v6 = vpop.f32.mrf.mxu1 }
 0x64a   : > { %2494 = vrot.lane.b32.xlu1 %v2493_v5, %s2691_s20 }
 0x64b   : > { %v1531_v7 = vpop.f32.mrf.mxu1 }
 0x64c   : > { %v2221_v7 = vld [vmem:[%s617_s0] ss:$0 sm:$0xff] }
 0x64d   : > { %v2371_v8 = vpop.f32.mrf.mxu1 }
 0x64f   : > { %v1624_v10 = vpop.f32.mrf.mxu1 }
 0x651   : > { %v2382_v56 = vpop.f32.mrf.mxu1 }
 0x653   : > { %v1627_v60 = vpop.f32.mrf.mxu1 }
 0x654   : > { %v2509_v60 = vld [vmem:[%s2919_s26 + $0x18] sm:$0xff]  }
 0x655   : > { %v2383_v11 = vpop.f32.mrf.mxu1 }
 0x656   : > { %v2510_v11 = vld [vmem:[%s2919_s26 + $0x10] sm:$0xff]  }
 0x657   : > { %v1672_v12 = vpop.f32.mrf.mxu0 }
 0x658   : > { %v2498_v13 = vpack.i.bf16 %v1672_v12, %v1624_v10  ;;  %v2511_v12 = vld [vmem:[%s2919_s26 + $0x8] sm:$0xff]  }
 0x659   : > { %v2388_v14 = vpop.f32.mrf.mxu0 }
 0x65a   : > { %2499 = vrot.lane.b32.xlu0 %v2498_v13, %s2692_s22  ;;  %v2512_v13 = vld [vmem:[%s2919_s26] sm:$0xff]  }
 0x65b   : > { %v1675_v15 = vpop.f32.mrf.mxu0  ;;  %v2222_v14 = vld [vmem:[%s625_s5] ss:$0 sm:$0xff] }
 0x65d   : > { %v2389_v16 = vpop.f32.mrf.mxu0 }
 0x699   : > { %v2490_v18 = vpop.permute.xlu0 %2489 }
 0x69a   : > { %v2492_v44 = vunpack.i.h.bf16 %v2490_v18  ;;  %v2491_v46 = vunpack.i.l.bf16 %v2490_v18 }
 0x69c   : > { %v1703_v22 = vsel %vm807_vm3, %v1384_v41, %v2492_v44  ;;  %v1702_v23 = vsel %vm807_vm3, %v1336_v37, %v2491_v46 }
 0x6bc   : > { %v2495_v19 = vpop.permute.xlu1 %2494 }
 0x6bd   : > { %v2497_v43 = vunpack.i.h.bf16 %v2495_v19  ;;  %v2496_v20 = vunpack.i.l.bf16 %v2495_v19 }
 0x6bf   : > { %v1706_v26 = vsel %vm1704_vm5, %v1703_v22, %v2497_v43  ;;  %v1705_v49 = vsel %vm1704_vm5, %v1702_v23, %v2496_v20 }
 0x6cc   : > { %v2500_v21 = vpop.permute.xlu0 %2499 }
 0x6cd   : > { %v2502_v24 = vunpack.i.h.bf16 %v2500_v21  ;;  %v2501_v25 = vunpack.i.l.bf16 %v2500_v21 }
 0x6cf   : > { %v1709_v27 = vsel %vm1707_vm6, %v1706_v26, %v2502_v24  ;;  %v1708_v28 = vsel %vm1707_vm6, %v1705_v49, %v2501_v25 }
 0x6d0   : > { %v1710_v29 = vpack.c.bf16 %v1709_v27, %v1708_v28 }
 0x6d2   : > { %2395 = vmatmul.mubr.msk.bf16.vlgmr.msra.gmra.mxu1 %vm648_vm1, %v1710_v29 }
 0x6d3   : > { %2414 = vmatprep.mubr.msk.bf16.mxu1 %vm2684_vm2, %v2683_v17  ;;  %2407 = vmatpush3.bf16.msra.mxu1 %v2509_v60 }
 0x6d4   : > { %2408 = vmatprep.subr.bf16.mxu1 %v2683_v17 }
 0x6d7   : > { %2409 = vmatpush3.bf16.msra.mxu1 %v2510_v11 }
 0x6d8   : > { %2410 = vmatprep.subr.bf16.mxu1 %v2683_v17 }
 0x6db   : > { %2411 = vmatpush3.bf16.msra.mxu1 %v2511_v12 }
 0x6dc   : > { %2412 = vmatprep.subr.bf16.mxu1 %v2683_v17 }
 0x6df   : > { %2413 = vmatpush3.bf16.msra.mxu1 %v2512_v13 }
 0x792   : > { %v1771_v31 = vpop.f32.mrf.mxu1 }
 0x793   : > { %v1772_v32 = vadd.f32 %v2216_v30, %v1771_v31 }
 0x794   : > { %v2396_v33 = vpop.f32.mrf.mxu1 }
 0x795   : > { %v3168_v34 = vadd.f32 %v1772_v32, %v2923_v2 }
 0x796   : > { %v1774_v57 = vpop.f32.mrf.mxu1 }
 0x797   : > { %v1775_v35 = vadd.f32 %v2216_v30, %v1774_v57  ;;  %v1782_v36 = vsel %vm648_vm1, %v3168_v34, 0.0 }
 0x798   : > { %1783 = vadd.xlane.f32.xlu1 %v1782_v36  ;;  %v2397_v37 = vpop.f32.mrf.mxu1  ;;  %v2226_v36 = vld [vmem:[%s633_s27] ss:$0 sm:$0xff]  ;;  %s2611_s27 = scalar_lea.vmem %s2006_s10, 256 }
 0x799   : > { %v3173_v38 = vadd.f32 %v1775_v35, %v2925_v3  ;;  %p2612_p0 = scmp.ne.s32.totalorder %s2006_s10, %s2611_s27  ;;  %p2619_p12 = scmp.lt.s32.totalorder %s2611_s27, %s2611_s27 }
 0x79b   : > { %v1785_v39 = vsel %vm648_vm1, %v3173_v38, 0.0  ;;  %p2613_p9 = pnand %p2612_p0, %p2439_p8  ;;  %p2620_p13 = por %p2619_p12, %p2618_p11 }
 0x79c   : > { %1786 = vadd.xlane.f32.xlu0 %v1785_v39 }
 0x79d   : > { %p2614_p10 = pneg %p2613_p9 }
 0x79f   : > { %p2621_p2 = pnand %p2620_p13, %p2614_p10 }
 0x821   : > { %v1784_v40 = vpop.xlane.xlu1 %1783 }
 0x822   : > { %v1788_v41 = vmul.f32 0.03125, %v1784_v40 }
 0x824   : > { %v1790_v2 = vsub.f32 %v3168_v34, %v1788_v41 }
 0x825   : > { %v1787_v42 = vpop.xlane.xlu0 %1786 }
 0x826   : > { %v1789_v45 = vmul.f32 0.03125, %v1787_v42  ;;  %v1792_v47 = vmul.f32 %v1790_v2, %v1790_v2 }
 0x828   : > { %v1791_v48 = vsub.f32 %v3173_v38, %v1789_v45  ;;  %v1794_v50 = vsel %vm648_vm1, %v1792_v47, 0.0 }
 0x829   : > { %1795 = vadd.xlane.f32.xlu0 %v1794_v50 }
 0x82a   : > { %v1793_v53 = vmul.f32 %v1791_v48, %v1791_v48 }
 0x82c   : > { %v1797_v3 = vsel %vm648_vm1, %v1793_v53, 0.0 }
 0x82d   : > { %1798 = vadd.xlane.f32.xlu0 %v1797_v3 }
 0x8b2   : > { %v1796_v58 = vpop.xlane.xlu0 %1795 }
 0x8b3   : > { %v1800_v52 = vmul.f32 0.03125, %v1796_v58 }
 0x8b5   : > { %v1802_v59 = vadd.f32 1e-06, %v1800_v52 }
 0x8b6   : > { %v1799_v51 = vpop.xlane.xlu0 %1798 }
 0x8b7   : > { %2549 = vrsqrt.f32 %v1802_v59  ;;  %v1801_v61 = vmul.f32 0.03125, %v1799_v51 }
 0x8b9   : > { %v1803_v62 = vadd.f32 1e-06, %v1801_v61 }
 0x8bb   : > { %2551 = vrsqrt.f32 %v1803_v62 }
 0x8c4   : > { %v2550_v63 = vpop.eup %2549 }
 0x8c5   : > { %v1806_v0 = vmul.f32 %v2550_v63, %v1790_v2 }
 0x8c7   : > { %v1814_v6 = vmul.f32 %v2220_v1, %v1806_v0 }
 0x8c8   : > { %v2552_v4 = vpop.eup %2551 }
 0x8c9   : > { %v1807_v5 = vmul.f32 %v2552_v4, %v1791_v48  ;;  %v1822_v9 = vadd.f32 %v2221_v7, %v1814_v6 }
 0x8cb   : > { %v1815_v8 = vmul.f32 %v2220_v1, %v1807_v5 }
 0x8cd   : > { %v1823_v10 = vadd.f32 %v2221_v7, %v1815_v8 }
 0x8cf   : > { %v1824_v56 = vpack.c.bf16 %v1823_v10, %v1822_v9 }
 0x8d1   : > { %2403 = vmatmul.mubr.msk.bf16.vlgmr.msra.gmra.mxu0 %vm648_vm1, %v1824_v56 }
 0x991   : > { %v1885_v15 = vpop.f32.mrf.mxu0 }
 0x992   : > { %v1886_v16 = vadd.f32 %v2222_v14, %v1885_v15 }
 0x993   : > { %v2404_v18 = vpop.f32.mrf.mxu0 }
 0x994   : > { %v1894_v19 = vmul.f32 0.044715, %v1886_v16  ;;  %v1892_v30 = vmul.f32 0.5, %v1886_v16 }
 0x995   : > { %v1888_v44 = vpop.f32.mrf.mxu0 }
 0x996   : > { %v1896_v46 = vmul.f32 %v1894_v19, %v1886_v16  ;;  %v1889_v43 = vadd.f32 %v2222_v14, %v1888_v44 }
 0x997   : > { %v2405_v20 = vpop.f32.mrf.mxu0 }
 0x998   : > { %v1898_v21 = vmul.f32 %v1896_v46, %v1886_v16  ;;  %v1895_v22 = vmul.f32 0.044715, %v1889_v43  ;;  %v1893_v31 = vmul.f32 0.5, %v1889_v43 }
 0x99a   : > { %v1900_v23 = vadd.f32 %v1898_v21, %v1886_v16  ;;  %v1897_v24 = vmul.f32 %v1895_v22, %v1889_v43 }
 0x99c   : > { %v1902_v25 = vmul.f32 0.7978846, %v1900_v23  ;;  %v1899_v17 = vmul.f32 %v1897_v24, %v1889_v43 }
 0x99e   : > { %2553 = vtanh.f32 %v1902_v25  ;;  %v1901_v26 = vadd.f32 %v1899_v17, %v1889_v43 }
 0x9a0   : > { %v1903_v49 = vmul.f32 0.7978846, %v1901_v26 }
 0x9a2   : > { %2555 = vtanh.f32 %v1903_v49 }
 0x9ab   : > { %v2554_v27 = vpop.eup %2553 }
 0x9ac   : > { %v1906_v28 = vadd.f32 1.0, %v2554_v27 }
 0x9ae   : > { %v1908_v33 = vmul.f32 %v1906_v28, %v1892_v30 }
 0x9af   : > { %v2556_v29 = vpop.eup %2555 }
 0x9b0   : > { %v1907_v32 = vadd.f32 1.0, %v2556_v29 }
 0x9b2   : > { %v1909_v57 = vmul.f32 %v1907_v32, %v1893_v31 }
 0x9b4   : > { %v1910_v35 = vpack.c.bf16 %v1909_v57, %v1908_v33 }
 0x9b6   : > { %2415 = vmatmul.mubr.msk.bf16.vlgmr.msra.gmra.mxu1 %vm1950_vm7, %v1910_v35 }
 0xa76   : > { %v1988_v37 = vpop.f32.mrf.mxu1 }
 0xa77   : > { %v1989_v39 = vadd.f32 %v2226_v36, %v1988_v37 }
 0xa78   : > { %v2416_v40 = vpop.f32.mrf.mxu1 }
 0xa79   : > { %v1995_v41 = vadd.f32 %v1989_v39, %v3168_v34 }
 0xa7a   : > { %v1991_v2 = vpop.f32.mrf.mxu1 }
 0xa7b   : > { %1997 = vst.msk [vmem:[#allocation7] sm:$0xff] %vm648_vm1, %v1995_v41  ;;  %v1992_v42 = vadd.f32 %v2226_v36, %v1991_v2 }
 0xa7c   : > { %v2417_v45 = vpop.f32.mrf.mxu1 }
 0xa7d   : > { %v1996_v47 = vadd.f32 %v1992_v42, %v3173_v38 }
 0xa7f   : > { %1998 = vst.msk [vmem:[#allocation7 + $0x8] sm:$0xff] %vm648_vm1, %v1996_v47 }
 0xa80   : > { %2624 = shalt.err (!%p2621_p2)
}
 0xa81   : > { %s2694_s9 = smov 128   ;;  %s3299_s13 = sld [smem:[#allocation23_spill]] }
 0xa87   : > { %2425 = dma.vmem_to_hbm [thread:$0]  (%p2439_p8), %s2006_s10, 256, %s3299_s13, [#allocation4], %s2694_s9, %s2694_s9, %s2690_s28  }
 0xa88   : > { %2660 = dma.done.wait (%p2439_p8), [#allocation4], 256  }
 0xa89   : > { %2662 = vsyncadd (%p2439_p8), [#allocation4], 4294967040 }
 0xa8a PF: > { %s3300_s28 = sld [smem:[#allocation13_spill]] }
 0xa8b   : > { %s3301_s25 = sld [smem:[#allocation11_spill]] }
 0xa8c   : > { %s3302_s26 = sld [smem:[#allocation12_spill]] }
 0xa8d   : > { %s3303_s27 = sld [smem:[#allocation14_spill]] }
 0xa90   : > { %p25_p3 = scmp.ge.s32.totalorder %s3300_s28, 4  }
 0xa92   :  { %27 = sbr.rel (!%p25_p3) target bundleno = 15 (0xf), region = 151 }
 0xa97   :  { %2021 = vsyncpa [#allocation3], 1 }
 0xa98   :  { %2023 = vsyncpa [#allocation3 + $0x1], 1 }
 0xa99   :  { %2024 = vsyncpa [#allocation6], 1 }
 0xa9a   :  { %2026 = vsyncpa [#allocation6 + $0x1], 1 }
 0xa9b   :  { %2027 = vsyncpa [#allocation4], 1 }
 0xa9c   :  { %2029 = vsyncpa [#allocation4 + $0x1], 1 }

</bundles_post_ra>
